<compile_context>
chip_gen: v5e
topology: v5e:2x2
jax: 0.10.0
libtpu: 0.0.40
codegen_flags: <defaults>
</compile_context>

<pallas_src>
import math
import jax
import jax.numpy as jnp
from jax.experimental import pallas as pl
from jax.experimental.pallas import tpu as pltpu

# ---------------- model sizes (stand-ins for args) ----------------
ZE = 32           # args.ze       - noise dim
ZDIM = 32         # args.z        - latent code dim
HIDDEN_S = 32     # args.hidden_s - generated hidden layer size (power of two)
OBS_SIZE = 16     # obs_size                                     (power of two)
N_ACTIONS = 4     # n_actions
BATCH = 8         # observation batch (shared across candidates)
POP = 16          # CEM candidate population (grid axis)

ENC_H = 150       # EncoderW hidden
G1H = 200         # GeneratorW1B hidden (weight & bias branches)
G2H = 100         # GeneratorW2B hidden (weight & bias branches)

L1N = HIDDEN_S * OBS_SIZE            # 512 flat generated l1
L2N = N_ACTIONS * HIDDEN_S           # 128 flat generated l2
OUT_PAD = 128                        # lane-padded action dim for the store

_F32 = jnp.float32
_BF16 = jnp.bfloat16


def _rup(x, m=128):
    return ((x + m - 1) // m) * m


# ---- hcat (concatenated stage-1 generator hidden) layout, 128-aligned split ----
H_G1W = 0                         # W1.linear1 branch (G1H)        [0, 200)
H2_OFF = _rup(H_G1W + G1H)        # 256 : start of second stage-2 operand
H_G1B = H2_OFF                    # W1.bias1 branch (G1H)          [256, 456)
H_G2W = H_G1B + G1H               # W2.linear1 branch (G2H)        [456, 556)
H_G2B = H_G2W + G2H               # W2.bias1 branch (G2H)          [556, 656)
HCAT_W = H_G2B + G2H              # 656
G2_ROWS = HCAT_W - H2_OFF         # 400

# ---- compact block-diagonal stage-2 output layout (128-aligned segments) ----
G2_B1 = 0                         # generated b1 (HIDDEN_S)
G2_V2 = 128                       # generated flat l2 (L2N)
G2_B2 = 256                       # generated b2 (N_ACTIONS), zero-padded to OUT_PAD
G2_W = G2_B2 + OUT_PAD            # 384

# ---- bias slab layout (one f32 (1, BIAS_SLAB) row, 128-aligned offsets) ----
OFF_BE1 = 0                       # encoder.linear1 bias (ENC_H)
OFF_BC = _rup(OFF_BE1 + ENC_H)    # 256  : composed stage-1 bias (HCAT_W)
OFF_BV1 = _rup(OFF_BC + HCAT_W)   # 1024 : flat-l1 bias (L1N)
OFF_BG2 = _rup(OFF_BV1 + L1N)     # 1536 : packed stage-2 bias (G2_W)
BIAS_SLAB = OFF_BG2 + G2_W        # 1920


def _mxu(a, b):
    """bf16 MXU matmul with f32 accumulation (elementwise path stays f32)."""
    return jnp.dot(a.astype(_BF16), b.astype(_BF16), preferred_element_type=_F32)


def _decode_consts(rows, cols, out_cols):
    """0/1 selectors s.t. (sel_r * v) @ sel_g == reshape(v, (rows, cols)).T,
    lane-padded with zero columns up to out_cols.  Built ONCE at pack time."""
    n = rows * cols
    j = jnp.arange(n)
    sel_r = (j[None, :] % cols == jnp.arange(cols)[:, None]).astype(_BF16)        # (cols, n)
    sel_g = ((j[:, None] // cols) == jnp.arange(out_cols)[None, :]).astype(_BF16)  # (n, out_cols)
    return sel_r, sel_g


# ---------------------------------------------------------------------------
# Fused kernel body: one CEM candidate per grid step.
#   z -> h_enc -> hcat -> generated (l1, b1, l2, b2) -> policy output.
# ---------------------------------------------------------------------------
def fused_forward_kernel(x_ref, z_ref, we1_ref, wc_ref, wv1_ref, wg2_ref,
                         sr1_ref, sg1_ref, sr2_ref, sg2_ref, bias_ref, o_ref):
    be1 = bias_ref[:, OFF_BE1:OFF_BE1 + ENC_H]       # (1, 150)
    b_comp = bias_ref[:, OFF_BC:OFF_BC + HCAT_W]     # (1, 656)
    b_v1 = bias_ref[:, OFF_BV1:OFF_BV1 + L1N]        # (1, 512)
    b_g2 = bias_ref[:, OFF_BG2:OFF_BG2 + G2_W]       # (1, 384)

    # ---- EncoderW stage 1 ----
    h_enc = jnp.maximum(_mxu(z_ref[...], we1_ref[...]) + be1, 0.0)          # (1, 150)

    # ---- EncoderW stage 2 pre-composed with all four stage-1 generators ----
    hcat = jnp.maximum(_mxu(h_enc, wc_ref[...]) + b_comp, 0.0)              # (1, 656)

    # ---- Generators stage 2: dense flat-l1 matmul + compact block-diagonal ----
    v1 = _mxu(hcat[:, H_G1W:H_G1W + G1H], wv1_ref[...]) + b_v1              # (1, 512)
    g2 = _mxu(hcat[:, H2_OFF:H2_OFF + G2_ROWS], wg2_ref[...]) + b_g2        # (1, 384)

    b1 = g2[:, G2_B1:G2_B1 + HIDDEN_S]               # (1, 32)
    v2 = g2[:, G2_V2:G2_V2 + L2N]                    # (1, 128)
    b2p = g2[:, G2_B2:G2_B2 + OUT_PAD]               # (1, 128) lanes >= 4 are structural zeros

    # ---- decode flat generated vectors straight into transposed layout ----
    l1t = _mxu(sr1_ref[...] * v1, sg1_ref[...])      # (OBS_SIZE, HIDDEN_S) == l1.T
    l2t = _mxu(sr2_ref[...] * v2, sg2_ref[...])      # (HIDDEN_S, OUT_PAD)  == l2.T lane-padded

    # ---- generated 2-layer MLP applied to the observation batch ----
    hid = jnp.maximum(_mxu(x_ref[...], l1t) + b1, 0.0)                      # (B, HIDDEN_S)
    o_ref[...] = jnp.tanh(_mxu(hid, l2t) + b2p)                             # (B, OUT_PAD)


# ---------------------------------------------------------------------------
# Wrapper: grid over the CEM population, weights VMEM-resident across steps.
# ---------------------------------------------------------------------------
@jax.jit
def cem_ah_forward(x, z, packed):
    we1, w_comp, w_v1, w_g2, sel_r1, sel_g1, sel_r2, sel_g2, biases = packed
    pop = z.shape[0]
    batch = x.shape[0]
    z3 = z.reshape(pop, 1, ZE)

    def fixed(arr):  # full-array block, constant block index -> loaded once, stays in VMEM
        nd = arr.ndim
        return pl.BlockSpec(arr.shape, lambda p, _nd=nd: (0,) * _nd)

    out_pad = pl.pallas_call(
        fused_forward_kernel,
        grid=(pop,),
        out_shape=jax.ShapeDtypeStruct((pop, batch, OUT_PAD), _F32),
        in_specs=[
            fixed(x),                                          # shared observation batch
            pl.BlockSpec((None, 1, ZE), lambda p: (p, 0, 0)),  # one candidate's z per step
            fixed(we1), fixed(w_comp), fixed(w_v1), fixed(w_g2),
            fixed(sel_r1), fixed(sel_g1), fixed(sel_r2), fixed(sel_g2),
            fixed(biases),
        ],
        out_specs=pl.BlockSpec((None, batch, OUT_PAD), lambda p: (p, 0, 0)),
        compiler_params=pltpu.CompilerParams(
            dimension_semantics=("parallel",)),
    )(x, z3, we1, w_comp, w_v1, w_g2, sel_r1, sel_g1, sel_r2, sel_g2, biases)
    return out_pad[:, :, :N_ACTIONS]


# ---------------------------------------------------------------------------
# One-time parameter packing (composition / compact block-diag / bf16 / decode
# constants / bias slab).  Zero per-step cost.
# ---------------------------------------------------------------------------
def pack_params(params):
    (we1, be1, we2, be2,
     wg1a, bg1a, wg1b, bg1b, wb1a, bb1a, wb1b, bb1b,
     wg2a, bg2a, wg2b, bg2b, wb2a, bb2a, wb2b, bb2b) = params

    # encoder.linear2 has no ReLU before the generators' linear1, so compose:
    # relu(codes @ Wa + ba) = relu(h_enc @ (we2 @ Wa) + (be2 @ Wa + ba))
    w_comp = jnp.zeros((ENC_H, HCAT_W), _F32)
    b_comp = jnp.zeros((1, HCAT_W), _F32)
    for off, wa, ba in ((H_G1W, wg1a, bg1a), (H_G1B, wb1a, bb1a),
                        (H_G2W, wg2a, bg2a), (H_G2B, wb2a, bb2a)):
        w_comp = w_comp.at[:, off:off + wa.shape[1]].set(we2 @ wa)
        b_comp = b_comp.at[:, off:off + wa.shape[1]].set(be2 @ wa + ba)

    # stage-2: dense flat-l1 weight + compact block-diagonal for b1 / l2 / b2
    w_v1 = wg1b                                            # (G1H, L1N), fully dense
    b_v1 = bg1b
    w_g2 = jnp.zeros((G2_ROWS, G2_W), _F32)                # rows follow hcat[H2_OFF:]
    w_g2 = w_g2.at[0:G1H, G2_B1:G2_B1 + HIDDEN_S].set(wb1b)            # W1.bias2
    w_g2 = w_g2.at[G1H:G1H + G2H, G2_V2:G2_V2 + L2N].set(wg2b)         # W2.linear2
    w_g2 = w_g2.at[G1H + G2H:G2_ROWS, G2_B2:G2_B2 + N_ACTIONS].set(wb2b)  # W2.bias2
    b_g2 = jnp.zeros((1, G2_W), _F32)
    b_g2 = b_g2.at[:, G2_B1:G2_B1 + HIDDEN_S].set(bb1b)
    b_g2 = b_g2.at[:, G2_V2:G2_V2 + L2N].set(bg2b)
    b_g2 = b_g2.at[:, G2_B2:G2_B2 + N_ACTIONS].set(bb2b)

    # all bias rows in a single lane-aligned f32 slab (sliced statically in-kernel)
    biases = jnp.zeros((1, BIAS_SLAB), _F32)
    biases = biases.at[:, OFF_BE1:OFF_BE1 + ENC_H].set(be1)
    biases = biases.at[:, OFF_BC:OFF_BC + HCAT_W].set(b_comp)
    biases = biases.at[:, OFF_BV1:OFF_BV1 + L1N].set(b_v1)
    biases = biases.at[:, OFF_BG2:OFF_BG2 + G2_W].set(b_g2)

    # decode selection constants (exact 0/1 values, stored bf16)
    sel_r1, sel_g1 = _decode_consts(HIDDEN_S, OBS_SIZE, HIDDEN_S)   # l1 (32,16) -> l1.T (16,32)
    sel_r2, sel_g2 = _decode_consts(N_ACTIONS, HIDDEN_S, OUT_PAD)   # l2 (4,32)  -> l2.T (32,128)

    bf = lambda a: a.astype(_BF16)
    return (bf(we1), bf(w_comp), bf(w_v1), bf(w_g2),
            sel_r1, sel_g1, sel_r2, sel_g2, biases)


# ---------------------------------------------------------------------------
# Deterministic parameter init (mimics nn.Linear default U(-1/sqrt(fan_in), ..))
# Weights stored pre-transposed as (in, out); biases as (1, out).
# ---------------------------------------------------------------------------
def _linear_params(key, fan_in, fan_out):
    kw, kb = jax.random.split(key)
    bound = 1.0 / math.sqrt(fan_in)
    w_t = jax.random.uniform(kw, (fan_in, fan_out), _F32, -bound, bound)
    b = jax.random.uniform(kb, (1, fan_out), _F32, -bound, bound)
    return w_t, b


def init_params(key):
    ks = jax.random.split(key, 10)
    we1, be1 = _linear_params(ks[0], ZE, ENC_H)                    # encoder.linear1
    we2, be2 = _linear_params(ks[1], ENC_H, ZDIM)                  # encoder.linear2
    wg1a, bg1a = _linear_params(ks[2], ZDIM, G1H)                  # W1.linear1
    wg1b, bg1b = _linear_params(ks[3], G1H, OBS_SIZE * HIDDEN_S)   # W1.linear2
    wb1a, bb1a = _linear_params(ks[4], ZDIM, G1H)                  # W1.bias1
    wb1b, bb1b = _linear_params(ks[5], G1H, HIDDEN_S)              # W1.bias2
    wg2a, bg2a = _linear_params(ks[6], ZDIM, G2H)                  # W2.linear1
    wg2b, bg2b = _linear_params(ks[7], G2H, HIDDEN_S * N_ACTIONS)  # W2.linear2
    wb2a, bb2a = _linear_params(ks[8], ZDIM, G2H)                  # W2.bias1
    wb2b, bb2b = _linear_params(ks[9], G2H, N_ACTIONS)             # W2.bias2
    return (we1, be1, we2, be2,
            wg1a, bg1a, wg1b, bg1b, wb1a, bb1a, wb1b, bb1b,
            wg2a, bg2a, wg2b, bg2b, wb2a, bb2a, wb2b, bb2b)


# ---------------------------------------------------------------------------
# Pure-JAX f32 reference using the canonical (unpacked) params — checks the
# packing, the composition and the kernel together.
# ---------------------------------------------------------------------------
def reference_forward(x, z, params):
    (we1, be1, we2, be2,
     wg1a, bg1a, wg1b, bg1b, wb1a, bb1a, wb1b, bb1b,
     wg2a, bg2a, wg2b, bg2b, wb2a, bb2a, wb2b, bb2b) = params
    codes = jnp.maximum(z @ we1 + be1, 0.0) @ we2 + be2                       # (P, ZDIM)
    l1 = (jnp.maximum(codes @ wg1a + bg1a, 0.0) @ wg1b + bg1b
          ).reshape(-1, HIDDEN_S, OBS_SIZE)                                   # (P, H, O)
    b1 = jnp.maximum(codes @ wb1a + bb1a, 0.0) @ wb1b + bb1b                  # (P, H)
    l2 = (jnp.maximum(codes @ wg2a + bg2a, 0.0) @ wg2b + bg2b
          ).reshape(-1, N_ACTIONS, HIDDEN_S)                                  # (P, A, H)
    b2 = jnp.maximum(codes @ wb2a + bb2a, 0.0) @ wb2b + bb2b                  # (P, A)
    h = jnp.maximum(jnp.einsum('bo,pho->pbh', x, l1) + b1[:, None, :], 0.0)   # (P, B, H)
    return jnp.tanh(jnp.einsum('pbh,pah->pba', h, l2) + b2[:, None, :])       # (P, B, A)


if __name__ == "__main__":
    key = jax.random.PRNGKey(0)
    k_params, k_x, k_z = jax.random.split(key, 3)

    params = init_params(k_params)
    packed = pack_params(params)                               # one-time packing
    x = jax.random.normal(k_x, (BATCH, OBS_SIZE), _F32)        # shared observation batch
    z = jax.random.normal(k_z, (POP, ZE), _F32)                # CEM candidate noise vectors

    out = jax.block_until_ready(cem_ah_forward(x, z, packed))
    ref = reference_forward(x, z, params)

    assert out.shape == (POP, BATCH, N_ACTIONS)
    # bf16 weight storage / bf16 MXU operands through a 6-matmul chain vs the
    # f32 reference -> tolerance loosened accordingly (a layout/packing bug
    # would produce O(0.3-1) errors, far above this).
    assert bool(jnp.allclose(out, ref, atol=8e-2, rtol=8e-2)), \
        float(jnp.max(jnp.abs(out - ref)))
    print("KERNEL_OK")
</pallas_src>

<mosaic_0001>
module attributes {stable_mosaic.version = 11 : i64} {
  func.func @fused_forward_kernel(%arg0: i32, %arg1: memref<8x16xf32, #tpu.memory_space<vmem>>, %arg2: memref<1x1x32xf32, #tpu.memory_space<vmem>>, %arg3: memref<32x150xbf16, #tpu.memory_space<vmem>>, %arg4: memref<150x656xbf16, #tpu.memory_space<vmem>>, %arg5: memref<200x512xbf16, #tpu.memory_space<vmem>>, %arg6: memref<400x384xbf16, #tpu.memory_space<vmem>>, %arg7: memref<16x512xbf16, #tpu.memory_space<vmem>>, %arg8: memref<512x32xbf16, #tpu.memory_space<vmem>>, %arg9: memref<32x128xbf16, #tpu.memory_space<vmem>>, %arg10: memref<128x128xbf16, #tpu.memory_space<vmem>>, %arg11: memref<1x1920xf32, #tpu.memory_space<vmem>>, %arg12: memref<1x8x128xf32, #tpu.memory_space<vmem>>) attributes {dimension_semantics = [#tpu.dimension_semantics<parallel>], iteration_bounds = array<i64: 16>, scalar_prefetch = 0 : i64, scratch_operands = 0 : i64, tpu.core_type = #tpu.core_type<tc>, window_params = [{pipeline_mode = #tpu.pipeline_mode<synchronous>, transform_indices = @transform_0, window_bounds = array<i64: 8, 16>}, {transform_indices = @transform_1, window_bounds = array<i64: 1, 1, 32>}, {pipeline_mode = #tpu.pipeline_mode<synchronous>, transform_indices = @transform_2, window_bounds = array<i64: 32, 150>}, {pipeline_mode = #tpu.pipeline_mode<synchronous>, transform_indices = @transform_3, window_bounds = array<i64: 150, 656>}, {pipeline_mode = #tpu.pipeline_mode<synchronous>, transform_indices = @transform_4, window_bounds = array<i64: 200, 512>}, {pipeline_mode = #tpu.pipeline_mode<synchronous>, transform_indices = @transform_5, window_bounds = array<i64: 400, 384>}, {pipeline_mode = #tpu.pipeline_mode<synchronous>, transform_indices = @transform_6, window_bounds = array<i64: 16, 512>}, {pipeline_mode = #tpu.pipeline_mode<synchronous>, transform_indices = @transform_7, window_bounds = array<i64: 512, 32>}, {pipeline_mode = #tpu.pipeline_mode<synchronous>, transform_indices = @transform_8, window_bounds = array<i64: 32, 128>}, {pipeline_mode = #tpu.pipeline_mode<synchronous>, transform_indices = @transform_9, window_bounds = array<i64: 128, 128>}, {pipeline_mode = #tpu.pipeline_mode<synchronous>, transform_indices = @transform_10, window_bounds = array<i64: 1, 1920>}, {transform_indices = @transform_11, window_bounds = array<i64: 1, 8, 128>}]} {
    %c0 = arith.constant 0 : index
    %c0_0 = arith.constant 0 : index
    %0 = vector.load %arg11[%c0, %c0_0] : memref<1x1920xf32, #tpu.memory_space<vmem>>, vector<1x150xf32>
    %c0_1 = arith.constant 0 : index
    %c256 = arith.constant 256 : index
    %1 = vector.load %arg11[%c0_1, %c256] : memref<1x1920xf32, #tpu.memory_space<vmem>>, vector<1x656xf32>
    %c0_2 = arith.constant 0 : index
    %c1024 = arith.constant 1024 : index
    %2 = vector.load %arg11[%c0_2, %c1024] : memref<1x1920xf32, #tpu.memory_space<vmem>>, vector<1x512xf32>
    %c0_3 = arith.constant 0 : index
    %c1536 = arith.constant 1536 : index
    %3 = vector.load %arg11[%c0_3, %c1536] : memref<1x1920xf32, #tpu.memory_space<vmem>>, vector<1x384xf32>
    %c0_4 = arith.constant 0 : index
    %c0_5 = arith.constant 0 : index
    %c0_6 = arith.constant 0 : index
    %4 = vector.load %arg2[%c0_4, %c0_5, %c0_6] : memref<1x1x32xf32, #tpu.memory_space<vmem>>, vector<1x1x32xf32>
    %5 = vector.shape_cast %4 : vector<1x1x32xf32> to vector<1x32xf32>
    %c0_7 = arith.constant 0 : index
    %c0_8 = arith.constant 0 : index
    %6 = vector.load %arg3[%c0_7, %c0_8] : memref<32x150xbf16, #tpu.memory_space<vmem>>, vector<32x150xbf16>
    %7 = arith.truncf %5 : vector<1x32xf32> to vector<1x32xbf16>
    %cst = arith.constant dense<0.000000e+00> : vector<1x150xf32>
    %8 = tpu.matmul %7, %6, %cst {dimension_numbers = #tpu.dot_dimension_numbers<[1], [0], [0], [1], [0, 0, 1, 1], [], []>} : vector<1x32xbf16>, vector<32x150xbf16>, vector<1x150xf32> -> vector<1x150xf32>
    %9 = arith.addf %8, %0 : vector<1x150xf32>
    %cst_9 = arith.constant 0.000000e+00 : f32
    %10 = vector.broadcast %cst_9 : f32 to vector<1x150xf32>
    %11 = arith.maximumf %9, %10 : vector<1x150xf32>
    %c0_10 = arith.constant 0 : index
    %c0_11 = arith.constant 0 : index
    %12 = vector.load %arg4[%c0_10, %c0_11] : memref<150x656xbf16, #tpu.memory_space<vmem>>, vector<150x656xbf16>
    %13 = arith.truncf %11 : vector<1x150xf32> to vector<1x150xbf16>
    %cst_12 = arith.constant dense<0.000000e+00> : vector<1x656xf32>
    %14 = tpu.matmul %13, %12, %cst_12 {dimension_numbers = #tpu.dot_dimension_numbers<[1], [0], [0], [1], [0, 0, 1, 1], [], []>} : vector<1x150xbf16>, vector<150x656xbf16>, vector<1x656xf32> -> vector<1x656xf32>
    %15 = arith.addf %14, %1 : vector<1x656xf32>
    %cst_13 = arith.constant 0.000000e+00 : f32
    %16 = vector.broadcast %cst_13 : f32 to vector<1x656xf32>
    %17 = arith.maximumf %15, %16 : vector<1x656xf32>
    %18 = vector.extract_strided_slice %17 {offsets = [0, 0], sizes = [1, 200], strides = [1, 1]} : vector<1x656xf32> to vector<1x200xf32>
    %c0_14 = arith.constant 0 : index
    %c0_15 = arith.constant 0 : index
    %19 = vector.load %arg5[%c0_14, %c0_15] : memref<200x512xbf16, #tpu.memory_space<vmem>>, vector<200x512xbf16>
    %20 = arith.truncf %18 : vector<1x200xf32> to vector<1x200xbf16>
    %cst_16 = arith.constant dense<0.000000e+00> : vector<1x512xf32>
    %21 = tpu.matmul %20, %19, %cst_16 {dimension_numbers = #tpu.dot_dimension_numbers<[1], [0], [0], [1], [0, 0, 1, 1], [], []>} : vector<1x200xbf16>, vector<200x512xbf16>, vector<1x512xf32> -> vector<1x512xf32>
    %22 = arith.addf %21, %2 : vector<1x512xf32>
    %23 = vector.extract_strided_slice %17 {offsets = [0, 256], sizes = [1, 400], strides = [1, 1]} : vector<1x656xf32> to vector<1x400xf32>
    %c0_17 = arith.constant 0 : index
    %c0_18 = arith.constant 0 : index
    %24 = vector.load %arg6[%c0_17, %c0_18] : memref<400x384xbf16, #tpu.memory_space<vmem>>, vector<400x384xbf16>
    %25 = arith.truncf %23 : vector<1x400xf32> to vector<1x400xbf16>
    %cst_19 = arith.constant dense<0.000000e+00> : vector<1x384xf32>
    %26 = tpu.matmul %25, %24, %cst_19 {dimension_numbers = #tpu.dot_dimension_numbers<[1], [0], [0], [1], [0, 0, 1, 1], [], []>} : vector<1x400xbf16>, vector<400x384xbf16>, vector<1x384xf32> -> vector<1x384xf32>
    %27 = arith.addf %26, %3 : vector<1x384xf32>
    %28 = vector.extract_strided_slice %27 {offsets = [0, 0], sizes = [1, 32], strides = [1, 1]} : vector<1x384xf32> to vector<1x32xf32>
    %29 = vector.extract_strided_slice %27 {offsets = [0, 128], sizes = [1, 128], strides = [1, 1]} : vector<1x384xf32> to vector<1x128xf32>
    %30 = vector.extract_strided_slice %27 {offsets = [0, 256], sizes = [1, 128], strides = [1, 1]} : vector<1x384xf32> to vector<1x128xf32>
    %c0_20 = arith.constant 0 : index
    %c0_21 = arith.constant 0 : index
    %31 = vector.load %arg7[%c0_20, %c0_21] : memref<16x512xbf16, #tpu.memory_space<vmem>>, vector<16x512xbf16>
    %32 = arith.extf %31 : vector<16x512xbf16> to vector<16x512xf32>
    %33 = vector.broadcast %22 : vector<1x512xf32> to vector<16x512xf32>
    %34 = arith.mulf %32, %33 : vector<16x512xf32>
    %c0_22 = arith.constant 0 : index
    %c0_23 = arith.constant 0 : index
    %35 = vector.load %arg8[%c0_22, %c0_23] : memref<512x32xbf16, #tpu.memory_space<vmem>>, vector<512x32xbf16>
    %36 = arith.truncf %34 : vector<16x512xf32> to vector<16x512xbf16>
    %cst_24 = arith.constant dense<0.000000e+00> : vector<16x32xf32>
    %37 = tpu.matmul %36, %35, %cst_24 {dimension_numbers = #tpu.dot_dimension_numbers<[1], [0], [0], [1], [0, 0, 1, 1], [], []>} : vector<16x512xbf16>, vector<512x32xbf16>, vector<16x32xf32> -> vector<16x32xf32>
    %c0_25 = arith.constant 0 : index
    %c0_26 = arith.constant 0 : index
    %38 = vector.load %arg9[%c0_25, %c0_26] : memref<32x128xbf16, #tpu.memory_space<vmem>>, vector<32x128xbf16>
    %39 = arith.extf %38 : vector<32x128xbf16> to vector<32x128xf32>
    %40 = vector.broadcast %29 : vector<1x128xf32> to vector<32x128xf32>
    %41 = arith.mulf %39, %40 : vector<32x128xf32>
    %c0_27 = arith.constant 0 : index
    %c0_28 = arith.constant 0 : index
    %42 = vector.load %arg10[%c0_27, %c0_28] : memref<128x128xbf16, #tpu.memory_space<vmem>>, vector<128x128xbf16>
    %43 = arith.truncf %41 : vector<32x128xf32> to vector<32x128xbf16>
    %cst_29 = arith.constant dense<0.000000e+00> : vector<32x128xf32>
    %44 = tpu.matmul %43, %42, %cst_29 {dimension_numbers = #tpu.dot_dimension_numbers<[1], [0], [0], [1], [0, 0, 1, 1], [], []>} : vector<32x128xbf16>, vector<128x128xbf16>, vector<32x128xf32> -> vector<32x128xf32>
    %c0_30 = arith.constant 0 : index
    %c0_31 = arith.constant 0 : index
    %45 = vector.load %arg1[%c0_30, %c0_31] : memref<8x16xf32, #tpu.memory_space<vmem>>, vector<8x16xf32>
    %46 = arith.truncf %45 : vector<8x16xf32> to vector<8x16xbf16>
    %47 = arith.truncf %37 : vector<16x32xf32> to vector<16x32xbf16>
    %cst_32 = arith.constant dense<0.000000e+00> : vector<8x32xf32>
    %48 = tpu.matmul %46, %47, %cst_32 {dimension_numbers = #tpu.dot_dimension_numbers<[1], [0], [0], [1], [0, 0, 1, 1], [], []>} : vector<8x16xbf16>, vector<16x32xbf16>, vector<8x32xf32> -> vector<8x32xf32>
    %49 = vector.broadcast %28 : vector<1x32xf32> to vector<8x32xf32>
    %50 = arith.addf %48, %49 : vector<8x32xf32>
    %cst_33 = arith.constant 0.000000e+00 : f32
    %51 = vector.broadcast %cst_33 : f32 to vector<8x32xf32>
    %52 = arith.maximumf %50, %51 : vector<8x32xf32>
    %53 = arith.truncf %52 : vector<8x32xf32> to vector<8x32xbf16>
    %54 = arith.truncf %44 : vector<32x128xf32> to vector<32x128xbf16>
    %cst_34 = arith.constant dense<0.000000e+00> : vector<8x128xf32>
    %55 = tpu.matmul %53, %54, %cst_34 {dimension_numbers = #tpu.dot_dimension_numbers<[1], [0], [0], [1], [0, 0, 1, 1], [], []>} : vector<8x32xbf16>, vector<32x128xbf16>, vector<8x128xf32> -> vector<8x128xf32>
    %56 = vector.broadcast %30 : vector<1x128xf32> to vector<8x128xf32>
    %57 = arith.addf %55, %56 : vector<8x128xf32>
    %58 = math.tanh %57 : vector<8x128xf32>
    %c0_35 = arith.constant 0 : index
    %c0_36 = arith.constant 0 : index
    %c0_37 = arith.constant 0 : index
    %59 = vector.load %arg12[%c0_35, %c0_36, %c0_37] : memref<1x8x128xf32, #tpu.memory_space<vmem>>, vector<1x8x128xf32>
    %60 = vector.shape_cast %59 : vector<1x8x128xf32> to vector<8x128xf32>
    %61 = vector.shape_cast %58 : vector<8x128xf32> to vector<1x8x128xf32>
    tpu.vector_store %arg12[%c0_35, %c0_36, %c0_37], %61 {strides = array<i32>} : memref<1x8x128xf32, #tpu.memory_space<vmem>>, vector<1x8x128xf32>,
    return
  }
  func.func @transform_0(%arg0: i32) -> (i32, i32) {
    %c0_i32 = arith.constant 0 : i32
    %c0_i32_0 = arith.constant 0 : i32
    %c0_i32_1 = arith.constant 0 : i32
    return %c0_i32, %c0_i32_0 : i32, i32
  }
  func.func @transform_1(%arg0: i32) -> (i32, i32, i32) {
    %c0_i32 = arith.constant 0 : i32
    %c0_i32_0 = arith.constant 0 : i32
    %c0_i32_1 = arith.constant 0 : i32
    return %arg0, %c0_i32, %c0_i32_0 : i32, i32, i32
  }
  func.func @transform_2(%arg0: i32) -> (i32, i32) {
    %c0_i32 = arith.constant 0 : i32
    %c0_i32_0 = arith.constant 0 : i32
    %c0_i32_1 = arith.constant 0 : i32
    return %c0_i32, %c0_i32_0 : i32, i32
  }
  func.func @transform_3(%arg0: i32) -> (i32, i32) {
    %c0_i32 = arith.constant 0 : i32
    %c0_i32_0 = arith.constant 0 : i32
    %c0_i32_1 = arith.constant 0 : i32
    return %c0_i32, %c0_i32_0 : i32, i32
  }
  func.func @transform_4(%arg0: i32) -> (i32, i32) {
    %c0_i32 = arith.constant 0 : i32
    %c0_i32_0 = arith.constant 0 : i32
    %c0_i32_1 = arith.constant 0 : i32
    return %c0_i32, %c0_i32_0 : i32, i32
  }
  func.func @transform_5(%arg0: i32) -> (i32, i32) {
    %c0_i32 = arith.constant 0 : i32
    %c0_i32_0 = arith.constant 0 : i32
    %c0_i32_1 = arith.constant 0 : i32
    return %c0_i32, %c0_i32_0 : i32, i32
  }
  func.func @transform_6(%arg0: i32) -> (i32, i32) {
    %c0_i32 = arith.constant 0 : i32
    %c0_i32_0 = arith.constant 0 : i32
    %c0_i32_1 = arith.constant 0 : i32
    return %c0_i32, %c0_i32_0 : i32, i32
  }
  func.func @transform_7(%arg0: i32) -> (i32, i32) {
    %c0_i32 = arith.constant 0 : i32
    %c0_i32_0 = arith.constant 0 : i32
    %c0_i32_1 = arith.constant 0 : i32
    return %c0_i32, %c0_i32_0 : i32, i32
  }
  func.func @transform_8(%arg0: i32) -> (i32, i32) {
    %c0_i32 = arith.constant 0 : i32
    %c0_i32_0 = arith.constant 0 : i32
    %c0_i32_1 = arith.constant 0 : i32
    return %c0_i32, %c0_i32_0 : i32, i32
  }
  func.func @transform_9(%arg0: i32) -> (i32, i32) {
    %c0_i32 = arith.constant 0 : i32
    %c0_i32_0 = arith.constant 0 : i32
    %c0_i32_1 = arith.constant 0 : i32
    return %c0_i32, %c0_i32_0 : i32, i32
  }
  func.func @transform_10(%arg0: i32) -> (i32, i32) {
    %c0_i32 = arith.constant 0 : i32
    %c0_i32_0 = arith.constant 0 : i32
    %c0_i32_1 = arith.constant 0 : i32
    return %c0_i32, %c0_i32_0 : i32, i32
  }
  func.func @transform_11(%arg0: i32) -> (i32, i32, i32) {
    %c0_i32 = arith.constant 0 : i32
    %c0_i32_0 = arith.constant 0 : i32
    %c0_i32_1 = arith.constant 0 : i32
    return %arg0, %c0_i32, %c0_i32_0 : i32, i32, i32
  }
}

</mosaic_0001>

<bundles_post_ra>
// kernel: cem_ah_forward.1
= control target key start
LH: loop header
LB: loop body
LE: loop exit
PB: predicated region body
PF: predicated region fallthrough
CT: control target
= control target key end

     0   :  { %s4414_s0 = inlined_call_operand.vmem [shape: f32[8,16], index: 0, kind: input, shape index: {}]   ;;  %s4415_s1 = inlined_call_operand.vmem [shape: f32[16,1,32], index: 1, kind: input, shape index: {}]   ;;  %s4416_s2 = inlined_call_operand.vmem [shape: bf16[32,150], index: 2, kind: input, shape index: {}]   ;;  %s4417_s3 = inlined_call_operand.hbm [shape: bf16[150,656], index: 3, kind: input, shape index: {}]   ;;  %s4418_s4 = inlined_call_operand.hbm [shape: bf16[200,512], index: 4, kind: input, shape index: {}]   ;;  %s4419_s5 = inlined_call_operand.hbm [shape: bf16[400,384], index: 5, kind: input, shape index: {}]   ;;  %s4420_s6 = inlined_call_operand.vmem [shape: bf16[16,512], index: 6, kind: input, shape index: {}]   ;;  %s4421_s7 = inlined_call_operand.vmem [shape: bf16[512,32], index: 7, kind: input, shape index: {}]   ;;  %s4422_s8 = inlined_call_operand.vmem [shape: bf16[32,128], index: 8, kind: input, shape index: {}]   ;;  %s4423_s9 = inlined_call_operand.vmem [shape: bf16[128,128], index: 9, kind: input, shape index: {}]   ;;  %s4424_s10 = inlined_call_operand.vmem [shape: f32[1,1920], index: 10, kind: input, shape index: {}]   ;;  %s4425_s11 = inlined_call_operand.vmem [shape: f32[16,8,128], index: 11, kind: output, shape index: {}]  }
   0x1   :  { %4426 = sst [smem:[#allocation9_spill]] %s4417_s3 }
   0x2   :  { %16 = vsyncpa [#allocation3], 0 }
   0x3   :  { %17 = vsyncpa [#allocation5], 0  ;;  %s4071_s17 = smov 0  }
   0x4 LB: > { %s321_s20 = sshll.u32 %s4418_s4, 4  ;;  %s4080_s21 = sadd.s32 4294967295, %s4000_s17   ;;  %s4000_s17 = sphi %s4071_s17, %s23_s17   ;;  %s322_s20 = int_to_ptr.hbm [resolvable:$true] %s321_s20 }
   0x5   : > { %p2706_p0 = scmp.ge.s32.totalorder %s4000_s17, 1  ;;  %p290_p1 = scmp.lt.s32.totalorder %s4000_s17, 17 }
   0x6   : > { %p3871_p2 = scmp.eq.s32.totalorder %s4080_s21, 0  ;;  %s4002_s23 = smov [#allocation4]  }
   0x7   : > { %p4085_p3 = pnand %p2706_p0, %p290_p1  ;;  %s323_s24 = sshll.u32 %s4002_s23, 4  ;;  %s324_s24 = int_to_ptr.vmem [resolvable:$true] %s323_s24 }
   0x8   : > { %s4428_s3 = sld [smem:[#allocation9_spill]]  ;;  %s4003_s29 = smov [#allocation2]  }
   0x9   : > { %p3861_p4 = pneg %p4085_p3  ;;  %s309_s30 = sshll.u32 %s4003_s29, 4  ;;  %s310_s30 = int_to_ptr.vmem [resolvable:$true] %s309_s30 }
   0xa   : > { %s4004_s12 = smov 256   ;;  %s4005_s13 = smov 16  }
   0xb   : > { %p4096_p5 = pnand %p3871_p2, %p3861_p4  ;;  %s335_s16 = sshll.u32 %s4419_s5, 4  ;;  %s336_s16 = int_to_ptr.hbm [resolvable:$true] %s335_s16 }
   0xc   : > { %s4006_s18 = smov 384   ;;  %s4007_s19 = smov 24  }
   0xd   : > { %3867 = dma.hbm_to_vmem [thread:$0]  (!%p4096_p5), %s322_s20, 6400, %s324_s24, [#allocation5], %s4004_s12, %s4004_s12, %s4005_s13  }
   0xe   : > { %s307_s27 = sshll.u32 %s4428_s3, 4  ;;  %s4008_s23 = smov [#allocation6]   ;;  %s308_s27 = int_to_ptr.hbm [resolvable:$true] %s307_s27 }
   0xf   : > { %3864 = dma.hbm_to_vmem [thread:$0]  (!%p4096_p5), %s308_s27, 7296, %s310_s30, [#allocation3], %s4006_s18, %s4006_s18, %s4007_s19  }
  0x10   : > { %s337_s25 = sshll.u32 %s4008_s23, 4  ;;  %s4009_s26 = smov 192   ;;  %s338_s25 = int_to_ptr.vmem [resolvable:$true] %s337_s25 }
  0x11   : > { %s4010_s3 = smov 12   ;;  %374 = sbr.rel (%p4085_p3) target bundleno = 892 (0x37c), region = 64 }
  0x12   : > { %3870 = dma.hbm_to_vmem [thread:$0]  (!%p4096_p5), %s336_s16, 9600, %s338_s25, [#allocation5], %s4009_s26, %s4009_s26, %s4010_s3  }
  0x16   : > { %3991 = dma.done.wait (%p3871_p2), [#allocation3], 7296  }
  0x17   : > { %3993 = vsyncadd (%p3871_p2), [#allocation3], 4294960000 }
  0x18   : > { %3995 = dma.done.wait (%p3871_p2), [#allocation5], 16000  }
  0x19   : > { %3997 = vsyncadd (%p3871_p2), [#allocation5], 4294951296  ;;  %p422_p6 = scmp.lt.s32.totalorder %s4080_s21, 15  ;;  %v2726_v0 = vld [vmem:[%s4416_s2 + $0x10] sm:$0xf]  ;;  %vm465_vm0 = vcmask 261120  }
  0x1a   : > { %v3622_v1 = vld [vmem:[%s4416_s2 + $0x14] sm:$0xf0]  ;;  %v3621_v2 = vld [vmem:[%s4416_s2 + $0x14] sm:$0xf]  ;;  %v2728_v4 = vld [vmem:[%s4416_s2 + $0x18] sm:$0xf0] }
  0x1b   : > { %s4431_s21 = smov (!%p422_p6, %s4080_s21), 15  ;;  %v2727_v3 = vor.u32 %v3622_v1, %v2726_v0  ;;  %v2718_v5 = vld [vmem:[%s4416_s2] sm:$0xf]  ;;  %v3620_v6 = vld [vmem:[%s4416_s2 + $0x4] sm:$0xf0]  ;;  %v2731_v7 = vor.u32 %v3621_v2, %v2728_v4  ;;  %vm858_vm1 = vcmask 1042432  }
  0x1c   : > { %s424_s22 = scalar_lea.vmem %s4415_s1, %s4431_s21  ;;  %v3619_v8 = vld [vmem:[%s4416_s2 + $0x4] sm:$0xf]  ;;  %v2720_v9 = vld [vmem:[%s4416_s2 + $0x8] sm:$0xf0]  ;;  %v2719_v11 = vor.u32 %v3620_v6, %v2718_v5  ;;  %v2904_v12 = vld [vmem:[#allocation2 + $0x150] sm:$0xf] }
  0x1d   : > { %v434_v10 = vld [vmem:[%s424_s22] sm:$0x1]  ;;  %475 = vmatpush.bf16.msra.mxu0 %v2727_v3  ;;  %v3668_v13 = vld [vmem:[#allocation2 + $0x164] sm:$0xf0]  ;;  %488 = vmatpush.bf16.msra.mxu3 %v2731_v7  ;;  %v2723_v15 = vor.u32 %v3619_v8, %v2720_v9  ;;  %v3662_v17 = vld [vmem:[#allocation2 + $0x134] sm:$0xf0] }
  0x1e   : > { %v2880_v14 = vld [vmem:[#allocation2 + $0x120] sm:$0xf]  ;;  %v2905_v16 = vor.u32 %v3668_v13, %v2904_v12  ;;  %v3665_v18 = vld [vmem:[#allocation2 + $0x154] sm:$0xf]  ;;  %v2906_v19 = vld [vmem:[#allocation2 + $0x168] sm:$0xf0]  ;;  %v439_v20 = vpack.c.bf16 %v434_v10, %v434_v10 }
  0x1f   : > { %v2881_v21 = vor.u32 %v3662_v17, %v2880_v14  ;;  %v2909_v22 = vor.u32 %v3665_v18, %v2906_v19  ;;  %v3659_v23 = vld [vmem:[#allocation2 + $0x124] sm:$0xf]  ;;  %v2882_v24 = vld [vmem:[#allocation2 + $0x138] sm:$0xf0]  ;;  %v2856_v25 = vld [vmem:[#allocation2 + $0xf0] sm:$0xf] }
  0x20   : > { %877 = vmatpush.bf16.msra.mxu2 %v2905_v16  ;;  %v3656_v26 = vld [vmem:[#allocation2 + $0x104] sm:$0xf0]  ;;  %v2885_v27 = vor.u32 %v3659_v23, %v2882_v24  ;;  %v3653_v28 = vld [vmem:[#allocation2 + $0xf4] sm:$0xf]  ;;  %v2858_v29 = vld [vmem:[#allocation2 + $0x108] sm:$0xf0] }
  0x21   : > { %476 = vmatpush.bf16.msra.mxu0 %v2719_v11  ;;  %489 = vmatpush.bf16.msra.mxu3 %v2723_v15  ;;  %v2857_v30 = vor.u32 %v3656_v26, %v2856_v25  ;;  %v2832_v31 = vld [vmem:[#allocation2 + $0xc0] sm:$0xf]  ;;  %v3650_v32 = vld [vmem:[#allocation2 + $0xd4] sm:$0xf0]  ;;  %v2861_v33 = vor.u32 %v3653_v28, %v2858_v29  ;;  %v4153_v34 = vld [vmem:[#allocation2 + $0x1b0] sm:$0x77] }
  0x22   : > { %v3647_v35 = vld [vmem:[#allocation2 + $0xc4] sm:$0xf]  ;;  %v2834_v36 = vld [vmem:[#allocation2 + $0xd8] sm:$0xf0]  ;;  %v721_v37 = vunpack.c.l.b16 %v4153_v34  ;;  %v2833_v38 = vor.u32 %v3650_v32, %v2832_v31  ;;  %v2808_v39 = vld [vmem:[#allocation2 + $0x90] sm:$0xf]  ;;  %v722_v19 = vunpack.c.h.b16 %v4153_v34 }
  0x23   : > { %v3644_v40 = vld [vmem:[#allocation2 + $0xa4] sm:$0xf0]  ;;  %v2928_v42 = vld [vmem:[#allocation2 + $0x180] sm:$0xf]  ;;  %v3674_v43 = vld [vmem:[#allocation2 + $0x194] sm:$0xf0]  ;;  %v2837_v44 = vor.u32 %v3647_v35, %v2834_v36 }
  0x24   : > { %2732 = vmatmul.msk.bf16.vlgmr.msra.gmra.mxu0 %vm465_vm0, %v439_v20  ;;  %878 = vmatpush.bf16.msra.mxu2 %v2881_v21  ;;  %v781_v41 = vpack.c.b16 %v721_v37, %v721_v37  ;;  %v2912_v45 = vld [vmem:[#allocation2 + $0x158] sm:$0xf]  ;;  %v3669_v46 = vld [vmem:[#allocation2 + $0x16c] sm:$0xf0]  ;;  %v3641_v47 = vld [vmem:[#allocation2 + $0x94] sm:$0xf]  ;;  %v2809_v50 = vor.u32 %v3644_v40, %v2808_v39  ;;  %v2929_v51 = vor.u32 %v3674_v43, %v2928_v42 }
  0x25   : > { %903 = vmatpush.bf16.msrb.mxu0 %v2909_v22  ;;  %2733 = vmatmul.msk.bf16.vlgmr.msra.gmra.mxu3 %vm465_vm0, %v439_v20  ;;  %v2810_v48 = vld [vmem:[#allocation2 + $0xa8] sm:$0xf0]  ;;  %v2784_v52 = vld [vmem:[#allocation2 + $0x60] sm:$0xf]  ;;  %v3638_v53 = vld [vmem:[#allocation2 + $0x74] sm:$0xf0]  ;;  %v2913_v54 = vor.u32 %v3669_v46, %v2912_v45  ;;  %v782_v24 = vpack.c.b16 %v722_v19, %v722_v19 }
  0x26   : > { %v860_v49 = vsel %vm858_vm1, %v781_v41, 0  ;;  %v2813_v55 = vor.u32 %v3641_v47, %v2810_v48  ;;  %v3635_v56 = vld [vmem:[#allocation2 + $0x64] sm:$0xf]  ;;  %v2786_v57 = vld [vmem:[#allocation2 + $0x78] sm:$0xf0]  ;;  %v2785_v58 = vor.u32 %v3638_v53, %v2784_v52  ;;  %vm854_vm2 = vcmask 179200  }
  0x27   : > { %896 = vmatpush.bf16.msrb.mxu3 %v860_v49  ;;  %v2760_v59 = vld [vmem:[#allocation2 + $0x30] sm:$0xf]  ;;  %v3632_v60 = vld [vmem:[#allocation2 + $0x44] sm:$0xf0]  ;;  %v2789_v61 = vor.u32 %v3635_v56, %v2786_v57  ;;  %v3629_v62 = vld [vmem:[#allocation2 + $0x34] sm:$0xf] }
  0x28   : > { %879 = vmatpush.bf16.msra.mxu2 %v2857_v30  ;;  %v2762_v63 = vld [vmem:[#allocation2 + $0x48] sm:$0xf0]  ;;  %v2761_v0 = vor.u32 %v3632_v60, %v2760_v59  ;;  %v2736_v1 = vld [vmem:[#allocation2] sm:$0xf]  ;;  %v3626_v2 = vld [vmem:[#allocation2 + $0x14] sm:$0xf0] }
  0x29   : > { %904 = vmatpush.bf16.msrb.mxu0 %v2885_v27  ;;  %v3666_v3 = vld [vmem:[#allocation2 + $0x15c] sm:$0xf]  ;;  %v2914_v4 = vld [vmem:[#allocation2 + $0x170] sm:$0xf0]  ;;  %v2765_v5 = vor.u32 %v3629_v62, %v2762_v63  ;;  %v2737_v6 = vor.u32 %v3626_v2, %v2736_v1  ;;  %v3660_v8 = vld [vmem:[#allocation2 + $0x12c] sm:$0xf] }
  0x2a   : > { %v2917_v7 = vor.u32 %v3666_v3, %v2914_v4  ;;  %v2890_v9 = vld [vmem:[#allocation2 + $0x140] sm:$0xf0]  ;;  %v3654_v11 = vld [vmem:[#allocation2 + $0xfc] sm:$0xf]  ;;  %v2866_v12 = vld [vmem:[#allocation2 + $0x110] sm:$0xf0] }
  0x2b   : > { %897 = vmatpush.bf16.msrb.mxu3 %v2929_v51  ;;  %v2893_v10 = vor.u32 %v3660_v8, %v2890_v9  ;;  %v552_v13 = vld [vmem:[#allocation2 + $0x1b8] sm:$0x77]  ;;  %v2869_v14 = vor.u32 %v3654_v11, %v2866_v12  ;;  %v3623_v16 = vld [vmem:[#allocation2 + $0x4] sm:$0xf]  ;;  %v2888_v18 = vld [vmem:[#allocation2 + $0x128] sm:$0xf] }
  0x2c   : > { %880 = vmatpush.bf16.msra.mxu2 %v2833_v38  ;;  %v724_v15 = vunpack.c.h.b16 %v552_v13  ;;  %v2738_v17 = vld [vmem:[#allocation2 + $0x18] sm:$0xf0]  ;;  %v3663_v21 = vld [vmem:[#allocation2 + $0x13c] sm:$0xf0]  ;;  %v3648_v25 = vld [vmem:[#allocation2 + $0xcc] sm:$0xf]  ;;  %v723_v35 = vunpack.c.l.b16 %v552_v13 }
  0x2d   : > { %905 = vmatpush.bf16.msrb.mxu0 %v2861_v33  ;;  %v2741_v20 = vor.u32 %v3623_v16, %v2738_v17  ;;  %v2889_v23 = vor.u32 %v3663_v21, %v2888_v18  ;;  %v2842_v26 = vld [vmem:[#allocation2 + $0xe0] sm:$0xf0]  ;;  %v863_v29 = vsel %vm858_vm1, %v782_v24, 0  ;;  %v2864_v30 = vld [vmem:[#allocation2 + $0xf8] sm:$0xf]  ;;  %vm1354_vm3 = vcmask 1043456  }
  0x2e   : > { %v784_v22 = vpack.c.b16 %v724_v15, %v724_v15  ;;  %v2845_v28 = vor.u32 %v3648_v25, %v2842_v26  ;;  %v3657_v31 = vld [vmem:[#allocation2 + $0x10c] sm:$0xf0]  ;;  %922 = vmatpush.bf16.msra.mxu1 %v863_v29  ;;  %v3672_v33 = vld [vmem:[#allocation2 + $0x18c] sm:$0xf]  ;;  %v2938_v34 = vld [vmem:[#allocation2 + $0x1a0] sm:$0xf0]  ;;  %v783_v42 = vpack.c.b16 %v723_v35, %v723_v35 }
  0x2f   : > { %929 = vmatpush.bf16.msra.mxu3 %v2913_v54  ;;  %v2865_v32 = vor.u32 %v3657_v31, %v2864_v30  ;;  %v2941_v36 = vor.u32 %v3672_v33, %v2938_v34  ;;  %v3671_v37 = vld [vmem:[#allocation2 + $0x184] sm:$0xf]  ;;  %v2930_v38 = vld [vmem:[#allocation2 + $0x198] sm:$0xf0]  ;;  %v2818_v41 = vld [vmem:[#allocation2 + $0xb0] sm:$0xf0] }
  0x30   : > { %881 = vmatpush.bf16.msra.mxu2 %v2809_v50  ;;  %v869_v27 = vsel %vm858_vm1, %v784_v22, 0  ;;  %v3642_v39 = vld [vmem:[#allocation2 + $0x9c] sm:$0xf]  ;;  %v2933_v40 = vor.u32 %v3671_v37, %v2930_v38  ;;  %v3651_v45 = vld [vmem:[#allocation2 + $0xdc] sm:$0xf0]  ;;  %v866_v46 = vsel %vm858_vm1, %v783_v42, 0 }
  0x31   : > { %906 = vmatpush.bf16.msrb.mxu0 %v2837_v44  ;;  %v2821_v43 = vor.u32 %v3642_v39, %v2818_v41  ;;  %v2840_v44 = vld [vmem:[#allocation2 + $0xc8] sm:$0xf]  ;;  %v3636_v48 = vld [vmem:[#allocation2 + $0x6c] sm:$0xf]  ;;  %v2794_v49 = vld [vmem:[#allocation2 + $0x80] sm:$0xf0] }
  0x32   : > { %923 = vmatpush.bf16.msra.mxu1 %v2933_v40  ;;  %v2841_v47 = vor.u32 %v3651_v45, %v2840_v44  ;;  %v2797_v50 = vor.u32 %v3636_v48, %v2794_v49  ;;  %v2936_v51 = vld [vmem:[#allocation2 + $0x188] sm:$0xf]  ;;  %v3675_v52 = vld [vmem:[#allocation2 + $0x19c] sm:$0xf0]  ;;  %v2816_v54 = vld [vmem:[#allocation2 + $0x98] sm:$0xf] }
  0x33   : > { %930 = vmatpush.bf16.msra.mxu3 %v2889_v23  ;;  %v2937_v53 = vor.u32 %v3675_v52, %v2936_v51  ;;  %v3630_v57 = vld [vmem:[#allocation2 + $0x3c] sm:$0xf]  ;;  %v2792_v60 = vld [vmem:[#allocation2 + $0x68] sm:$0xf]  ;;  %v3624_v63 = vld [vmem:[#allocation2 + $0xc] sm:$0xf] }
  0x34   : > { %882 = vmatpush.bf16.msra.mxu2 %v2785_v58  ;;  %v2770_v58 = vld [vmem:[#allocation2 + $0x50] sm:$0xf0]  ;;  %v2768_v2 = vld [vmem:[#allocation2 + $0x38] sm:$0xf]  ;;  %v3633_v3 = vld [vmem:[#allocation2 + $0x4c] sm:$0xf0] }
  0x35   : > { %907 = vmatpush.bf16.msrb.mxu0 %v2813_v55  ;;  %v3645_v55 = vld [vmem:[#allocation2 + $0xac] sm:$0xf0]  ;;  %v2773_v59 = vor.u32 %v3630_v57, %v2770_v58  ;;  %v2769_v4 = vor.u32 %v3633_v3, %v2768_v2  ;;  %v430_v8 = vld [vmem:[%s4424_s10] sm:$0x3]  ;;  %v3667_v12 = vld [vmem:[#allocation2 + $0x164] sm:$0xf] }
  0x36   : > { %948 = vmatpush.bf16.msrb.mxu1 %v866_v46  ;;  %v2817_v56 = vor.u32 %v3645_v55, %v2816_v54  ;;  %v461_v9 = vperm.slane %v430_v8, 0  ;;  %v2922_v13 = vld [vmem:[#allocation2 + $0x178] sm:$0xf0]  ;;  %v462_v16 = vperm.slane %v430_v8, 1  ;;  %v2898_v21 = vld [vmem:[#allocation2 + $0x148] sm:$0xf0] }
  0x37   : > { %931 = vmatpush.bf16.msra.mxu3 %v2865_v32  ;;  %v2925_v17 = vor.u32 %v3667_v12, %v2922_v13  ;;  %v2920_v26 = vld [vmem:[#allocation2 + $0x160] sm:$0xf]  ;;  %v3655_v29 = vld [vmem:[#allocation2 + $0x104] sm:$0xf]  ;;  %v2874_v30 = vld [vmem:[#allocation2 + $0x118] sm:$0xf0] }
  0x38   : > { %883 = vmatpush.bf16.msra.mxu2 %v2761_v0  ;;  %v2746_v0 = vld [vmem:[#allocation2 + $0x20] sm:$0xf0]  ;;  %v2896_v33 = vld [vmem:[#allocation2 + $0x130] sm:$0xf]  ;;  %v3664_v34 = vld [vmem:[#allocation2 + $0x144] sm:$0xf0] }
  0x39   : > { %908 = vmatpush.bf16.msrb.mxu0 %v2789_v61  ;;  %v3639_v61 = vld [vmem:[#allocation2 + $0x7c] sm:$0xf0]  ;;  %v2749_v1 = vor.u32 %v3624_v63, %v2746_v0  ;;  %v2944_v38 = vld [vmem:[#allocation2 + $0x190] sm:$0xf]  ;;  %v3676_v39 = vld [vmem:[#allocation2 + $0x1a4] sm:$0xf0] }
  0x3a   : > { %949 = vmatpush.bf16.msrb.mxu1 %v2937_v53  ;;  %v2793_v62 = vor.u32 %v3639_v61, %v2792_v60  ;;  %v3649_v40 = vld [vmem:[#allocation2 + $0xd4] sm:$0xf]  ;;  %v2850_v41 = vld [vmem:[#allocation2 + $0xe8] sm:$0xf0]  ;;  %v2945_v44 = vor.u32 %v3676_v39, %v2944_v38  ;;  %v2872_v46 = vld [vmem:[#allocation2 + $0x100] sm:$0xf] }
  0x3b   : > { %932 = vmatpush.bf16.msra.mxu3 %v2841_v47  ;;  %v2853_v45 = vor.u32 %v3649_v40, %v2850_v41  ;;  %v3658_v47 = vld [vmem:[#allocation2 + $0x114] sm:$0xf0]  ;;  %v3643_v48 = vld [vmem:[#allocation2 + $0xa4] sm:$0xf]  ;;  %v2826_v49 = vld [vmem:[#allocation2 + $0xb8] sm:$0xf0] }
  0x3c   : > { %884 = vmatpush.bf16.msra.mxu2 %v2737_v6  ;;  %v3627_v6 = vld [vmem:[#allocation2 + $0x1c] sm:$0xf0]  ;;  %v2848_v51 = vld [vmem:[#allocation2 + $0xd0] sm:$0xf]  ;;  %v3652_v52 = vld [vmem:[#allocation2 + $0xe4] sm:$0xf0]  ;;  %v2829_v54 = vor.u32 %v3643_v48, %v2826_v49 }
  0x3d   : > { %909 = vmatpush.bf16.msrb.mxu0 %v2765_v5  ;;  %v2744_v5 = vld [vmem:[#allocation2 + $0x8] sm:$0xf]  ;;  %v3637_v55 = vld [vmem:[#allocation2 + $0x74] sm:$0xf]  ;;  %v2849_v57 = vor.u32 %v3652_v52, %v2848_v51  ;;  %v2824_v58 = vld [vmem:[#allocation2 + $0xa0] sm:$0xf] }
  0x3e   : > { %v2778_v63 = vld [vmem:[#allocation2 + $0x58] sm:$0xf0]  ;;  %v3640_v2 = vld [vmem:[#allocation2 + $0x84] sm:$0xf0]  ;;  %v2754_v8 = vld [vmem:[#allocation2 + $0x28] sm:$0xf0] }
  0x3f   : > { %933 = vmatpush.bf16.msra.mxu3 %v2817_v56  ;;  %v2802_v56 = vld [vmem:[#allocation2 + $0x88] sm:$0xf0]  ;;  %v3070_v12 = vld [vmem:[#allocation4 + $0xe0] sm:$0xf]  ;;  %v3707_v13 = vld [vmem:[#allocation4 + $0xec] sm:$0xf0] }
  0x40   : > { %955 = vmatpush.bf16.msrb.mxu2 %v2917_v7  ;;  %v2745_v7 = vor.u32 %v3627_v6, %v2744_v5  ;;  %v2805_v61 = vor.u32 %v3637_v55, %v2802_v56  ;;  %v2946_v5 = vld [vmem:[#allocation2 + $0x1a8] sm:$0xf0]  ;;  %v3022_v38 = vld [vmem:[#allocation4 + $0x80] sm:$0xf]  ;;  %v3695_v39 = vld [vmem:[#allocation4 + $0x8c] sm:$0xf0] }
  0x41   : > { %910 = vmatpush.bf16.msrb.mxu0 %v2741_v20  ;;  %v3661_v20 = vld [vmem:[#allocation2 + $0x134] sm:$0xf]  ;;  %v3721_v40 = vld [vmem:[#allocation4 + $0x164] sm:$0xf]  ;;  %v3120_v49 = vld [vmem:[#allocation4 + $0x150] sm:$0xf0] }
  0x42   : > { %v2901_v25 = vor.u32 %v3661_v20, %v2898_v21  ;;  %v3054_v21 = vld [vmem:[#allocation4 + $0xc0] sm:$0xf]  ;;  %v3717_v48 = vld [vmem:[#allocation4 + $0x144] sm:$0xf]  ;;  %v3056_v51 = vld [vmem:[#allocation4 + $0xd0] sm:$0xf0] }
  0x43   : > { %934 = vmatpush.bf16.msra.mxu3 %v2793_v62  ;;  %v3631_v62 = vld [vmem:[#allocation2 + $0x44] sm:$0xf]  ;;  %v3006_v52 = vld [vmem:[#allocation4 + $0x60] sm:$0xf]  ;;  %v3719_v56 = vld [vmem:[#allocation4 + $0x14c] sm:$0xf0] }
  0x44   : > { %956 = vmatpush.bf16.msrb.mxu2 %v2893_v10  ;;  %v2781_v6 = vor.u32 %v3631_v62, %v2778_v63  ;;  %v3118_v55 = vld [vmem:[#allocation4 + $0x140] sm:$0xf]  ;;  %v3040_v63 = vld [vmem:[#allocation4 + $0xb0] sm:$0xf0]  ;;  %vm1350_vm4 = vcmask 588800   ;;  %vm1982_vm5 = vcmask 130048  }
  0x45   : > { %974 = vmatpush.bf16.msra.mxu0 %v869_v27  ;;  %v3670_v27 = vld [vmem:[#allocation2 + $0x174] sm:$0xf0]  ;;  %v3119_v62 = vor.u32 %v3719_v56, %v3118_v55  ;;  %s2715_s18 = sshll.u32 %s4431_s21, 3 }
  0x46   : > { %v2921_v32 = vor.u32 %v3670_v27, %v2920_v26  ;;  %v3038_v26 = vld [vmem:[#allocation4 + $0xa0] sm:$0xf]  ;;  %v3699_v27 = vld [vmem:[#allocation4 + $0xac] sm:$0xf0]  ;;  %s428_s25 = scalar_lea.vmem %s4425_s11, %s2715_s18 }
  0x47   : > { %935 = vmatpush.bf16.msra.mxu3 %v2769_v4  ;;  %v3673_v4 = vld [vmem:[#allocation2 + $0x194] sm:$0xf] }
  0x48   : > { %957 = vmatpush.bf16.msrb.mxu2 %v2869_v14  ;;  %v4164_v14 = vld [vmem:[#allocation2 + $0x1c0] sm:$0x77] }
  0x49   : > { %975 = vmatpush.bf16.msra.mxu0 %v2941_v36  ;;  %v725_v18 = vunpack.c.l.b16 %v4164_v14  ;;  %v2877_v36 = vor.u32 %v3655_v29, %v2874_v30  ;;  %v726_v53 = vunpack.c.h.b16 %v4164_v14  ;;  %v2752_v29 = vld [vmem:[#allocation2 + $0x10] sm:$0xf]  ;;  %v3628_v30 = vld [vmem:[#allocation2 + $0x24] sm:$0xf0] }
  0x4b   : > { %936 = vmatpush.bf16.msra.mxu3 %v2745_v7  ;;  %v786_v60 = vpack.c.b16 %v726_v53, %v726_v53  ;;  %v3625_v7 = vld [vmem:[#allocation2 + $0x14] sm:$0xf]  ;;  %v3691_v53 = vld [vmem:[#allocation4 + $0x6c] sm:$0xf0] }
  0x4c   : > { %958 = vmatpush.bf16.msrb.mxu2 %v2845_v28  ;;  %v785_v28 = vpack.c.b16 %v725_v18, %v725_v18  ;;  %v2757_v18 = vor.u32 %v3625_v7, %v2754_v8  ;;  %v3024_v8 = vld [vmem:[#allocation4 + $0x90] sm:$0xf0] }
  0x4d   : > { %v875_v3 = vsel %vm858_vm1, %v786_v60, 0  ;;  %v3697_v60 = vld [vmem:[#allocation4 + $0xa4] sm:$0xf] }
  0x4e   : > { %v872_v37 = vsel %vm858_vm1, %v785_v28, 0 }
  0x50   : > { %959 = vmatpush.bf16.msrb.mxu2 %v2821_v43  ;;  %v2897_v43 = vor.u32 %v3664_v34, %v2896_v33  ;;  %v2753_v33 = vor.u32 %v3628_v30, %v2752_v29  ;;  %v3134_v34 = vld [vmem:[#allocation4 + $0x160] sm:$0xf]  ;;  %v3700_v29 = vld [vmem:[#allocation4 + $0xb4] sm:$0xf0] }
  0x54   : > { %960 = vmatpush.bf16.msrb.mxu2 %v2797_v50  ;;  %v2873_v50 = vor.u32 %v3658_v47, %v2872_v46  ;;  %v3701_v46 = vld [vmem:[#allocation4 + $0xc4] sm:$0xf]  ;;  %v3023_v47 = vor.u32 %v3695_v39, %v3022_v38  ;;  %v1088_v39 = vld [vmem:[#allocation4 + $0x188] sm:$0xff] }
  0x58   : > { %961 = vmatpush.bf16.msrb.mxu2 %v2773_v59  ;;  %v3646_v59 = vld [vmem:[#allocation2 + $0xb4] sm:$0xf0] }
  0x59   : > { %v2825_v0 = vor.u32 %v3646_v59, %v2824_v58  ;;  %v3104_v58 = vld [vmem:[#allocation4 + $0x130] sm:$0xf0]  ;;  %v3059_v59 = vor.u32 %v3701_v46, %v3056_v51  ;;  %v3677_v51 = vld [vmem:[#allocation4 + $0x4] sm:$0xf] }
  0x5c   : > { %962 = vmatpush.bf16.msrb.mxu2 %v2749_v1  ;;  %v2800_v1 = vld [vmem:[#allocation2 + $0x70] sm:$0xf] }
  0xa1   : > { %v478_v10 = vpop.f32.mrf.mxu0 }
  0xa2   : > { %v479_v11 = vadd.f32 %v478_v10, %v461_v9  ;;  %v1087_v9 = vld [vmem:[#allocation4 + $0x180] sm:$0xff]  ;;  %v2801_v10 = vor.u32 %v3640_v2, %v2800_v1  ;;  %v3687_v1 = vld [vmem:[#allocation4 + $0x4c] sm:$0xf0] }
  0xa3   : > { %v1238_v14 = vunpack.c.h.b16 %v1087_v9  ;;  %v1237_v20 = vunpack.c.l.b16 %v1087_v9  ;;  %v2974_v9 = vld [vmem:[#allocation4 + $0x20] sm:$0xf] }
  0xa4   : > { %v495_v15 = vmax.f32 %v479_v11, 0.0  ;;  %v2949_v11 = vor.u32 %v3673_v4, %v2946_v5  ;;  %v3715_v4 = vld [vmem:[#allocation4 + $0x12c] sm:$0xf0]  ;;  %v3693_v5 = vld [vmem:[#allocation4 + $0x84] sm:$0xf] }
  0xa6   : > { %v4167_v19 = vpack.c.bf16 %v495_v15, %v495_v15  ;;  %v2776_v15 = vld [vmem:[#allocation2 + $0x40] sm:$0xf] }
  0xa8   : > { %v491_v22 = vpop.f32.mrf.mxu3  ;;  %885 = vmatmul.bf16.vlgmr.msra.gmra.mxu2 %v4167_v19  ;;  %911 = vmatmul.bf16.vlgmr.msrb.gmra.mxu0 %v4167_v19 }
  0xa9   : > { %v492_v23 = vadd.f32 %v491_v22, %v462_v16  ;;  %v480_v24 = vpop.f32.mrf.mxu0  ;;  %1007 = vmatpush.bf16.msrb.mxu0 %v2925_v17  ;;  %v3634_v16 = vld [vmem:[#allocation2 + $0x54] sm:$0xf0]  ;;  %v3071_v17 = vor.u32 %v3707_v13, %v3070_v12  ;;  %v3078_v13 = vld [vmem:[#allocation4 + $0xe8] sm:$0xf] }
  0xaa   : > { %v3703_v22 = vld [vmem:[#allocation4 + $0xcc] sm:$0xf0] }
  0xab   : > { %v496_v31 = vmax.f32 %v492_v23, 0.0  ;;  %v1290_v23 = vpack.c.b16 %v1238_v14, %v1238_v14  ;;  %1367 = vmatpush.bf16.msra.mxu2 %v3071_v17  ;;  %v3055_v24 = vor.u32 %v3703_v22, %v3054_v21  ;;  %v3711_v12 = vld [vmem:[#allocation4 + $0x10c] sm:$0xf0]  ;;  %v3708_v14 = vld [vmem:[#allocation4 + $0xf4] sm:$0xf0] }
  0xac   : > { %v3079_v21 = vor.u32 %v3708_v14, %v3078_v13  ;;  %v3062_v22 = vld [vmem:[#allocation4 + $0xc8] sm:$0xf]  ;;  %v3718_v13 = vld [vmem:[#allocation4 + $0x14c] sm:$0xf]  ;;  %v3128_v14 = vld [vmem:[#allocation4 + $0x158] sm:$0xf0] }
  0xad   : > { %v4171_v35 = vpack.c.bf16 %v496_v31, %v496_v31  ;;  %1008 = vmatpush.bf16.msrb.mxu0 %v2901_v25  ;;  %v2777_v25 = vor.u32 %v3634_v16, %v2776_v15  ;;  %v1359_v28 = vsel %vm1354_vm3, %v1290_v23, 0  ;;  %v1289_v31 = vpack.c.b16 %v1237_v20, %v1237_v20  ;;  %v3008_v20 = vld [vmem:[#allocation4 + $0x70] sm:$0xf0]  ;;  %v3704_v23 = vld [vmem:[#allocation4 + $0xd4] sm:$0xf0] }
  0xae   : > { %v3027_v15 = vor.u32 %v3693_v5, %v3024_v8  ;;  %v3684_v5 = vld [vmem:[#allocation4 + $0x34] sm:$0xf0]  ;;  %v3064_v8 = vld [vmem:[#allocation4 + $0xd8] sm:$0xf0] }
  0xaf   : > { %2950 = vmatmul.msk.bf16.vlgmr.msrb.gmra.mxu3 %vm854_vm2, %v4171_v35  ;;  %2951 = vmatmul.msk.bf16.vlgmr.msra.gmra.mxu1 %vm854_vm2, %v4171_v35  ;;  %v1356_v41 = vsel %vm1354_vm3, %v1289_v31, 0  ;;  %v3681_v31 = vld [vmem:[#allocation4 + $0x24] sm:$0xf] }
  0xb0   : > { %v493_v42 = vpop.f32.mrf.mxu3  ;;  %981 = vmatpush.bf16.msra.mxu1 %v2921_v32  ;;  %1000 = vmatpush.bf16.msrb.mxu3 %v872_v37  ;;  %v3039_v32 = vor.u32 %v3699_v27, %v3038_v26  ;;  %v3072_v37 = vld [vmem:[#allocation4 + $0xf0] sm:$0xf0]  ;;  %v3063_v27 = vor.u32 %v3704_v23, %v3062_v22  ;;  %v3110_v23 = vld [vmem:[#allocation4 + $0x128] sm:$0xf] }
  0xb1   : > { %1009 = vmatpush.bf16.msrb.mxu0 %v2877_v36  ;;  %1368 = vmatpush.bf16.msra.mxu2 %v3055_v24  ;;  %v3705_v36 = vld [vmem:[#allocation4 + $0xe4] sm:$0xf]  ;;  %v3723_v42 = vld [vmem:[#allocation4 + $0x16c] sm:$0xf0]  ;;  %v2992_v26 = vld [vmem:[#allocation4 + $0x50] sm:$0xf0] }
  0xb4   : > { %982 = vmatpush.bf16.msra.mxu1 %v2897_v43  ;;  %1001 = vmatpush.bf16.msrb.mxu3 %v2945_v44  ;;  %v3136_v43 = vld [vmem:[#allocation4 + $0x170] sm:$0xf0] }
  0xb5   : > { %1010 = vmatpush.bf16.msrb.mxu0 %v2853_v45  ;;  %1369 = vmatpush.bf16.msra.mxu2 %v3039_v32  ;;  %v3139_v44 = vor.u32 %v3721_v40, %v3136_v43  ;;  %v3075_v45 = vor.u32 %v3705_v36, %v3072_v37  ;;  %v2976_v32 = vld [vmem:[#allocation4 + $0x30] sm:$0xf0]  ;;  %v3696_v36 = vld [vmem:[#allocation4 + $0x94] sm:$0xf0]  ;;  %v3014_v40 = vld [vmem:[#allocation4 + $0x68] sm:$0xf] }
  0xb6   : > { %v2979_v37 = vor.u32 %v3681_v31, %v2976_v32  ;;  %v2958_v43 = vld [vmem:[#allocation4] sm:$0xf]  ;;  %v3094_v32 = vld [vmem:[#allocation4 + $0x108] sm:$0xf] }
  0xb8   : > { %983 = vmatpush.bf16.msra.mxu1 %v2873_v50  ;;  %963 = vmatmul.bf16.vlgmr.msrb.gmra.mxu2 %v4167_v19  ;;  %v3135_v50 = vor.u32 %v3723_v42, %v3134_v34  ;;  %v3030_v34 = vld [vmem:[#allocation4 + $0x88] sm:$0xf] }
  0xb9   : > { %2953 = vmatmul.msk.bf16.vlgmr.msra.gmra.mxu0 %vm854_vm2, %v4171_v35  ;;  %1370 = vmatpush.bf16.msra.mxu2 %v3023_v47  ;;  %v3031_v38 = vor.u32 %v3696_v36, %v3030_v34  ;;  %v3709_v47 = vld [vmem:[#allocation4 + $0x104] sm:$0xf]  ;;  %v3710_v36 = vld [vmem:[#allocation4 + $0x10c] sm:$0xf] }
  0xba   : > { %1011 = vmatpush.bf16.msrb.mxu0 %v2829_v54  ;;  %v3123_v54 = vor.u32 %v3717_v48, %v3120_v49  ;;  %v3088_v48 = vld [vmem:[#allocation4 + $0x110] sm:$0xf0] }
  0xbc   : > { %984 = vmatpush.bf16.msra.mxu1 %v2849_v57  ;;  %v3713_v57 = vld [vmem:[#allocation4 + $0x124] sm:$0xf] }
  0xbd   : > { %v3107_v2 = vor.u32 %v3713_v57, %v3104_v58  ;;  %v3688_v57 = vld [vmem:[#allocation4 + $0x54] sm:$0xf0]  ;;  %v3706_v58 = vld [vmem:[#allocation4 + $0xec] sm:$0xf] }
  0xbe   : > { %1012 = vmatpush.bf16.msrb.mxu0 %v2805_v61  ;;  %v3007_v61 = vor.u32 %v3691_v53, %v3006_v52  ;;  %v2960_v52 = vld [vmem:[#allocation4 + $0x10] sm:$0xf0] }
  0xbf   : > { %937 = vmatmul.bf16.vlgmr.msra.gmra.mxu3 %v4167_v19  ;;  %2952 = vmatmul.msk.bf16.vlgmr.msrb.gmra.mxu1 %vm854_vm2, %v4171_v35  ;;  %v2963_v56 = vor.u32 %v3677_v51, %v2960_v52 }
  0xc0   : > { %985 = vmatpush.bf16.msra.mxu1 %v2825_v0  ;;  %1026 = vmatpush.bf16.msra.mxu3 %v875_v3  ;;  %v2990_v0 = vld [vmem:[#allocation4 + $0x40] sm:$0xf] }
  0xc1   : > { %v3102_v3 = vld [vmem:[#allocation4 + $0x120] sm:$0xf]  ;;  %1371 = vmatpush.bf16.msra.mxu2 %v3007_v61  ;;  %v3080_v61 = vld [vmem:[#allocation4 + $0xf8] sm:$0xf0] }
  0xc2   : > { %1013 = vmatpush.bf16.msrb.mxu0 %v2781_v6  ;;  %v2991_v6 = vor.u32 %v3687_v1, %v2990_v0  ;;  %v3103_v7 = vor.u32 %v3715_v4, %v3102_v3  ;;  %v3724_v0 = vld [vmem:[#allocation4 + $0x174] sm:$0xf0]  ;;  %v3144_v3 = vld [vmem:[#allocation4 + $0x178] sm:$0xf0] }
  0xc4   : > { %986 = vmatpush.bf16.msra.mxu1 %v2801_v10  ;;  %1027 = vmatpush.bf16.msra.mxu3 %v2949_v11  ;;  %v3683_v10 = vld [vmem:[#allocation4 + $0x2c] sm:$0xf0]  ;;  %v3086_v11 = vld [vmem:[#allocation4 + $0x100] sm:$0xf] }
  0xc5   : > { %1372 = vmatpush.bf16.msra.mxu2 %v2991_v6  ;;  %v2975_v16 = vor.u32 %v3683_v10, %v2974_v9  ;;  %v3087_v17 = vor.u32 %v3711_v12, %v3086_v11  ;;  %v3702_v6 = vld [vmem:[#allocation4 + $0xcc] sm:$0xf]  ;;  %v3126_v10 = vld [vmem:[#allocation4 + $0x148] sm:$0xf]  ;;  %v3720_v11 = vld [vmem:[#allocation4 + $0x154] sm:$0xf0] }
  0xc6   : > { %1014 = vmatpush.bf16.msrb.mxu0 %v2757_v18  ;;  %v3689_v18 = vld [vmem:[#allocation4 + $0x64] sm:$0xf]  ;;  %v3067_v9 = vor.u32 %v3702_v6, %v3064_v8  ;;  %v3127_v12 = vor.u32 %v3720_v11, %v3126_v10  ;;  %v3792_v6 = vld [vmem:[#allocation6 + $0x218] sm:$0xf0]  ;;  %v3238_v8 = vld [vmem:[#allocation6 + $0xa8] sm:$0xf] }
  0xc7   : > { %v3011_v24 = vor.u32 %v3689_v18, %v3008_v20  ;;  %v3698_v18 = vld [vmem:[#allocation4 + $0xac] sm:$0xf]  ;;  %v3747_v11 = vld [vmem:[#allocation6 + $0xb0] sm:$0xf0] }
  0xc8   : > { %987 = vmatpush.bf16.msra.mxu1 %v2777_v25  ;;  %v3685_v25 = vld [vmem:[#allocation4 + $0x44] sm:$0xf] }
  0xc9   : > { %1015 = vmatmul.bf16.vlgmr.msrb.gmra.mxu0 %v4167_v19  ;;  %1373 = vmatpush.bf16.msra.mxu2 %v2975_v16  ;;  %v2995_v30 = vor.u32 %v3685_v25, %v2992_v26  ;;  %v2966_v16 = vld [vmem:[#allocation4 + $0x8] sm:$0xf]  ;;  %v3714_v26 = vld [vmem:[#allocation4 + $0x12c] sm:$0xf] }
  0xca   : > { %1409 = vmatpush.bf16.msra.mxu0 %v1359_v28  ;;  %v3046_v28 = vld [vmem:[#allocation4 + $0xa8] sm:$0xf] }
  0xcc   : > { %988 = vmatpush.bf16.msra.mxu1 %v2753_v33  ;;  %v3047_v33 = vor.u32 %v3700_v29, %v3046_v28  ;;  %v3694_v29 = vld [vmem:[#allocation4 + $0x8c] sm:$0xf] }
  0xce   : > { %1410 = vmatpush.bf16.msra.mxu0 %v3139_v44  ;;  %v3679_v44 = vld [vmem:[#allocation4 + $0xc] sm:$0xf0] }
  0xcf   : > { %989 = vmatmul.bf16.vlgmr.msra.gmra.mxu1 %v4167_v19  ;;  %2954 = vmatmul.msk.bf16.vlgmr.msrb.gmra.mxu3 %vm854_vm2, %v4171_v35  ;;  %v3043_v19 = vor.u32 %v3697_v60, %v3040_v63  ;;  %v2959_v46 = vor.u32 %v3679_v44, %v2958_v43  ;;  %v3142_v63 = vld [vmem:[#allocation4 + $0x168] sm:$0xf]  ;;  %v3682_v44 = vld [vmem:[#allocation4 + $0x2c] sm:$0xf] }
  0xd0   : > { %1383 = vmatpush.bf16.msrb.mxu1 %v1356_v41  ;;  %1393 = vmatpush.bf16.msrb.mxu3 %v3075_v45  ;;  %v3692_v41 = vld [vmem:[#allocation4 + $0x74] sm:$0xf0]  ;;  %v1240_v45 = vunpack.c.h.b16 %v1088_v39  ;;  %v3143_v1 = vor.u32 %v3724_v0, %v3142_v63 }
  0xd1   : > { %v3015_v42 = vor.u32 %v3692_v41, %v3014_v40  ;;  %1374 = vmatpush.bf16.msra.mxu2 %v2959_v46  ;;  %v3016_v40 = vld [vmem:[#allocation4 + $0x78] sm:$0xf0] }
  0xd2   : > { %1411 = vmatpush.bf16.msra.mxu0 %v3123_v54  ;;  %v1292_v53 = vpack.c.b16 %v1240_v45, %v1240_v45  ;;  %v2998_v54 = vld [vmem:[#allocation4 + $0x48] sm:$0xf]  ;;  %v2984_v45 = vld [vmem:[#allocation4 + $0x38] sm:$0xf0] }
  0xd3   : > { %v2999_v60 = vor.u32 %v3688_v57, %v2998_v54  ;;  %v2987_v46 = vor.u32 %v3682_v44, %v2984_v45  ;;  %v3334_v57 = vld [vmem:[#allocation6 + $0x168] sm:$0xf]  ;;  %v3759_v44 = vld [vmem:[#allocation6 + $0x110] sm:$0xf0] }
  0xd4   : > { %1384 = vmatpush.bf16.msrb.mxu1 %v3135_v50  ;;  %1394 = vmatpush.bf16.msrb.mxu3 %v3059_v59  ;;  %v3091_v50 = vor.u32 %v3709_v47, %v3088_v48  ;;  %v1365_v59 = vsel %vm1354_vm3, %v1292_v53, 0  ;;  %v4199_v47 = vld [vmem:[%s4424_s10 + $0x2] sm:$0x3f]  ;;  %v3678_v48 = vld [vmem:[#allocation4 + $0xc] sm:$0xf] }
  0xd5   : > { %v842_v54 = vperm.slane %v4199_v47, 0  ;;  %v3382_v45 = vld [vmem:[#allocation6 + $0x1c8] sm:$0xf] }
  0xd6   : > { %1412 = vmatpush.bf16.msra.mxu0 %v3107_v2  ;;  %v3722_v2 = vld [vmem:[#allocation4 + $0x16c] sm:$0xf] }
  0xd7   : > { %v3147_v4 = vor.u32 %v3722_v2, %v3144_v3  ;;  %v3322_v2 = vld [vmem:[#allocation6 + $0x150] sm:$0xf] }
  0xd8   : > { %1385 = vmatpush.bf16.msrb.mxu1 %v3119_v62  ;;  %1395 = vmatpush.bf16.msrb.mxu3 %v3043_v19  ;;  %v3083_v62 = vor.u32 %v3706_v58, %v3080_v61  ;;  %v2982_v19 = vld [vmem:[#allocation4 + $0x28] sm:$0xf]  ;;  %v3430_v61 = vld [vmem:[#allocation6 + $0x228] sm:$0xf] }
  0xda   : > { %1413 = vmatpush.bf16.msra.mxu0 %v3091_v50  ;;  %v843_v50 = vperm.slane %v4199_v47, 1 }
  0xdc   : > { %1386 = vmatpush.bf16.msrb.mxu1 %v3103_v7  ;;  %1396 = vmatpush.bf16.msrb.mxu3 %v3027_v15  ;;  %v2983_v7 = vor.u32 %v3684_v5, %v2982_v19  ;;  %v3131_v15 = vor.u32 %v3718_v13, %v3128_v14  ;;  %v3768_v19 = vld [vmem:[#allocation6 + $0x158] sm:$0xf0]  ;;  %v3418_v5 = vld [vmem:[#allocation6 + $0x210] sm:$0xf]  ;;  %v3798_v13 = vld [vmem:[#allocation6 + $0x248] sm:$0xf0] }
  0xde   : > { %1461 = vmatpush.bf16.msrb.mxu0 %v1365_v59 }
  0xdf   : > { %2955 = vmatmul.msk.bf16.vlgmr.msra.gmra.mxu3 %vm854_vm2, %v4171_v35  ;;  %v1239_v35 = vunpack.c.l.b16 %v1088_v39  ;;  %v3690_v39 = vld [vmem:[#allocation4 + $0x6c] sm:$0xf] }
  0xe0   : > { %1387 = vmatpush.bf16.msrb.mxu1 %v3087_v17  ;;  %1397 = vmatpush.bf16.msrb.mxu3 %v3011_v24  ;;  %v3680_v17 = vld [vmem:[#allocation4 + $0x14] sm:$0xf0]  ;;  %v3019_v41 = vor.u32 %v3690_v39, %v3016_v40  ;;  %v3214_v39 = vld [vmem:[#allocation6 + $0x78] sm:$0xf]  ;;  %v3741_v40 = vld [vmem:[#allocation6 + $0x80] sm:$0xf0] }
  0xe1   : > { %v1291_v49 = vpack.c.b16 %v1239_v35, %v1239_v35  ;;  %v2967_v20 = vor.u32 %v3680_v17, %v2966_v16  ;;  %v3716_v24 = vld [vmem:[#allocation4 + $0x134] sm:$0xf0]  ;;  %v3686_v35 = vld [vmem:[#allocation4 + $0x4c] sm:$0xf]  ;;  %v3310_v16 = vld [vmem:[#allocation6 + $0x138] sm:$0xf] }
  0xe2   : > { %1462 = vmatpush.bf16.msrb.mxu0 %v3147_v4  ;;  %v3111_v25 = vor.u32 %v3716_v24, %v3110_v23  ;;  %v3765_v17 = vld [vmem:[#allocation6 + $0x140] sm:$0xf0]  ;;  %v3239_v24 = vor.u32 %v3747_v11, %v3238_v8  ;;  %v3358_v8 = vld [vmem:[#allocation6 + $0x198] sm:$0xf] }
  0xe3   : > { %v1362_v55 = vsel %vm1354_vm3, %v1291_v49, 0  ;;  %v2968_v49 = vld [vmem:[#allocation4 + $0x18] sm:$0xf0] }
  0xe4   : > { %1419 = vmatpush.bf16.msra.mxu1 %v3079_v21  ;;  %1398 = vmatpush.bf16.msrb.mxu3 %v2995_v30  ;;  %v3048_v21 = vld [vmem:[#allocation4 + $0xb8] sm:$0xf0]  ;;  %v2971_v52 = vor.u32 %v3678_v48, %v2968_v49  ;;  %v3215_v49 = vor.u32 %v3741_v40, %v3214_v39  ;;  %v3764_v39 = vld [vmem:[#allocation6 + $0x13c] sm:$0xf] }
  0xe5   : > { %1435 = vmatpush.bf16.msrb.mxu2 %v1362_v55  ;;  %v3051_v22 = vor.u32 %v3698_v18, %v3048_v21  ;;  %v3032_v30 = vld [vmem:[#allocation4 + $0x98] sm:$0xf0]  ;;  %v3419_v18 = vor.u32 %v3792_v6, %v3418_v5  ;;  %v3406_v21 = vld [vmem:[#allocation6 + $0x1f8] sm:$0xf] }
  0xe6   : > { %1463 = vmatpush.bf16.msrb.mxu0 %v3131_v15  ;;  %v3035_v31 = vor.u32 %v3694_v29, %v3032_v30  ;;  %v3323_v15 = vor.u32 %v3768_v19, %v3322_v2  ;;  %v3311_v29 = vor.u32 %v3765_v17, %v3310_v16  ;;  %v3298_v30 = vld [vmem:[#allocation6 + $0x120] sm:$0xf]  ;;  %v3262_v19 = vld [vmem:[#allocation6 + $0xd8] sm:$0xf]  ;;  %v3767_v16 = vld [vmem:[#allocation6 + $0x154] sm:$0xf] }
  0xe7   : > { %v3324_v17 = vld [vmem:[#allocation6 + $0x15c] sm:$0xf0] }
  0xe8   : > { %1420 = vmatpush.bf16.msra.mxu1 %v3063_v27  ;;  %1399 = vmatpush.bf16.msrb.mxu3 %v2979_v37  ;;  %v3112_v27 = vld [vmem:[#allocation4 + $0x138] sm:$0xf0] }
  0xe9   : > { %1436 = vmatpush.bf16.msrb.mxu2 %v3143_v1  ;;  %v3115_v28 = vor.u32 %v3714_v26, %v3112_v27  ;;  %v3096_v37 = vld [vmem:[#allocation4 + $0x118] sm:$0xf0]  ;;  %v3226_v27 = vld [vmem:[#allocation6 + $0x90] sm:$0xf] }
  0xeb   : > { %1464 = vmatpush.bf16.msrb.mxu0 %v3115_v28  ;;  %v3744_v28 = vld [vmem:[#allocation6 + $0x98] sm:$0xf0] }
  0xec   : > { %1421 = vmatpush.bf16.msra.mxu1 %v3047_v33  ;;  %1400 = vmatpush.bf16.msrb.mxu3 %v2963_v56  ;;  %v3712_v33 = vld [vmem:[#allocation4 + $0x114] sm:$0xf0] }
  0xed   : > { %1437 = vmatpush.bf16.msrb.mxu2 %v3127_v12  ;;  %v3095_v34 = vor.u32 %v3712_v33, %v3094_v32  ;;  %v3442_v12 = vld [vmem:[#allocation6 + $0x240] sm:$0xf]  ;;  %v3762_v32 = vld [vmem:[#allocation6 + $0x128] sm:$0xf0] }
  0xee   : > { %v3394_v33 = vld [vmem:[#allocation6 + $0x1e0] sm:$0xf] }
  0xf0   : > { %1422 = vmatpush.bf16.msra.mxu1 %v3031_v38  ;;  %1445 = vmatpush.bf16.msra.mxu3 %v3083_v62  ;;  %v3099_v38 = vor.u32 %v3710_v36, %v3096_v37  ;;  %v3795_v62 = vld [vmem:[#allocation6 + $0x230] sm:$0xf0]  ;;  %v3227_v37 = vor.u32 %v3744_v28, %v3226_v27  ;;  %v3432_v27 = vld [vmem:[#allocation6 + $0x234] sm:$0xf0]  ;;  %v3346_v28 = vld [vmem:[#allocation6 + $0x180] sm:$0xf] }
  0xf1   : > { %1438 = vmatpush.bf16.msrb.mxu2 %v3111_v25  ;;  %v3431_v3 = vor.u32 %v3795_v62, %v3430_v61  ;;  %v3443_v25 = vor.u32 %v3798_v13, %v3442_v12  ;;  %v3190_v61 = vld [vmem:[#allocation6 + $0x48] sm:$0xf]  ;;  %v3178_v13 = vld [vmem:[#allocation6 + $0x30] sm:$0xf] }
  0xf2   : > { %1465 = vmatpush.bf16.msrb.mxu0 %v3099_v38 }
  0xf4   : > { %1423 = vmatpush.bf16.msra.mxu1 %v3015_v42  ;;  %1446 = vmatpush.bf16.msra.mxu3 %v3067_v9  ;;  %v3000_v42 = vld [vmem:[#allocation4 + $0x58] sm:$0xf0] }
  0xf5   : > { %1439 = vmatpush.bf16.msrb.mxu2 %v3095_v34  ;;  %v3003_v43 = vor.u32 %v3686_v35, %v3000_v42  ;;  %v3786_v34 = vld [vmem:[#allocation6 + $0x1e8] sm:$0xf0]  ;;  %v3299_v35 = vor.u32 %v3762_v32, %v3298_v30  ;;  %v3286_v42 = vld [vmem:[#allocation6 + $0x108] sm:$0xf]  ;;  %v3166_v32 = vld [vmem:[#allocation6 + $0x18] sm:$0xf] }
  0xf8   : > { %1424 = vmatpush.bf16.msra.mxu1 %v2999_v60  ;;  %1447 = vmatpush.bf16.msra.mxu3 %v3051_v22  ;;  %v3771_v60 = vld [vmem:[#allocation6 + $0x170] sm:$0xf0]  ;;  %v3789_v22 = vld [vmem:[#allocation6 + $0x200] sm:$0xf0] }
  0xf9   : > { %v3335_v1 = vor.u32 %v3771_v60, %v3334_v57  ;;  %v3370_v57 = vld [vmem:[#allocation6 + $0x1b0] sm:$0xf] }
  0xfc   : > { %1425 = vmatpush.bf16.msra.mxu1 %v2983_v7  ;;  %1448 = vmatpush.bf16.msra.mxu3 %v3035_v31  ;;  %v3407_v31 = vor.u32 %v3789_v22, %v3406_v21  ;;  %v3750_v21 = vld [vmem:[#allocation6 + $0xc8] sm:$0xf0] }
  0xfd   : > { %v3794_v22 = vld [vmem:[#allocation6 + $0x22c] sm:$0xf] }
 0x100   : > { %1426 = vmatpush.bf16.msra.mxu1 %v2967_v20  ;;  %1449 = vmatpush.bf16.msra.mxu3 %v3019_v41 }
 0x104   : > { %1450 = vmatpush.bf16.msra.mxu3 %v3003_v43  ;;  %v3395_v43 = vor.u32 %v3786_v34, %v3394_v33  ;;  %v3327_v33 = vor.u32 %v3767_v16, %v3324_v17  ;;  %v3797_v34 = vld [vmem:[#allocation6 + $0x244] sm:$0xf] }
 0x108   : > { %1451 = vmatpush.bf16.msra.mxu3 %v2987_v46  ;;  %v3783_v46 = vld [vmem:[#allocation6 + $0x1d0] sm:$0xf0] }
 0x10c   : > { %1452 = vmatpush.bf16.msra.mxu3 %v2971_v52  ;;  %v845_v52 = vperm.slane %v4199_v47, 3 }
 0x125   : > { %v912_v51 = vpop.f32.mrf.mxu0 }
 0x126   : > { %v913_v53 = vadd.f32 %v912_v51, %v843_v50  ;;  %v3202_v50 = vld [vmem:[#allocation6 + $0x60] sm:$0xf]  ;;  %v3738_v51 = vld [vmem:[#allocation6 + $0x68] sm:$0xf0] }
 0x127   : > { %v3203_v60 = vor.u32 %v3738_v51, %v3202_v50  ;;  %v3154_v50 = vld [vmem:[#allocation6] sm:$0xf] }
 0x12b   : > { %v886_v55 = vpop.f32.mrf.mxu2 }
 0x12c   : > { %v925_v56 = vpop.f32.mrf.mxu1  ;;  %v887_v63 = vadd.f32 %v886_v55, %v842_v54  ;;  %v3274_v54 = vld [vmem:[#allocation6 + $0xf0] sm:$0xf]  ;;  %v3383_v55 = vor.u32 %v3783_v46, %v3382_v45 }
 0x12d   : > { %v926_v58 = vadd.f32 %v925_v56, %v913_v53  ;;  %v914_v59 = vpop.f32.mrf.mxu0  ;;  %v3287_v53 = vor.u32 %v3759_v44, %v3286_v42  ;;  %v3756_v56 = vld [vmem:[#allocation6 + $0xf8] sm:$0xf0]  ;;  %v846_v42 = vperm.slane %v4199_v47, 4 }
 0x12f   : > { %v1034_v0 = vmax.f32 %v926_v58, 0.0  ;;  %v3780_v58 = vld [vmem:[#allocation6 + $0x1b8] sm:$0xf0] }
 0x130   : > { %v3371_v5 = vor.u32 %v3780_v58, %v3370_v57  ;;  %v3240_v57 = vld [vmem:[#allocation6 + $0xb4] sm:$0xf0] }
 0x131   : > { %v4203_v4 = vpack.c.bf16 %v1034_v0, %v1034_v0  ;;  %v3770_v0 = vld [vmem:[#allocation6 + $0x16c] sm:$0xf] }
 0x132   : > { %v899_v7 = vpop.f32.mrf.mxu3 }
 0x133   : > { %v900_v9 = vadd.f32 %v899_v7, %v887_v63  ;;  %3148 = vmatmul.msk.bf16.vlgmr.msrb.gmra.mxu1 %vm1350_vm4, %v4203_v4  ;;  %3149 = vmatmul.msk.bf16.vlgmr.msra.gmra.mxu0 %vm1350_vm4, %v4203_v4  ;;  %v888_v10 = vpop.f32.mrf.mxu2  ;;  %v3735_v63 = vld [vmem:[#allocation6 + $0x50] sm:$0xf0]  ;;  %v3753_v7 = vld [vmem:[#allocation6 + $0xe0] sm:$0xf0] }
 0x134   : > { %1999 = vmatpush.bf16.msrb.mxu1 %v3335_v1  ;;  %v927_v14 = vpop.f32.mrf.mxu1  ;;  %2012 = vmatpush.bf16.msra.mxu0 %v3431_v3  ;;  %v3336_v1 = vld [vmem:[#allocation6 + $0x174] sm:$0xf0]  ;;  %v3275_v3 = vor.u32 %v3756_v56, %v3274_v54  ;;  %v844_v10 = vperm.slane %v4199_v47, 2  ;;  %v3191_v12 = vor.u32 %v3735_v63, %v3190_v61  ;;  %v3761_v54 = vld [vmem:[#allocation6 + $0x124] sm:$0xf] }
 0x135   : > { %v1033_v20 = vmax.f32 %v900_v9, 0.0  ;;  %v3777_v9 = vld [vmem:[#allocation6 + $0x1a0] sm:$0xf0]  ;;  %v3339_v14 = vor.u32 %v3770_v0, %v3336_v1  ;;  %v3746_v56 = vld [vmem:[#allocation6 + $0xac] sm:$0xf] }
 0x136   : > { %v4209_v23 = vpop.f32.mrf.mxu0  ;;  %v3788_v63 = vld [vmem:[#allocation6 + $0x1fc] sm:$0xf]  ;;  %v3408_v0 = vld [vmem:[#allocation6 + $0x204] sm:$0xf0]  ;;  %v3743_v1 = vld [vmem:[#allocation6 + $0x94] sm:$0xf] }
 0x137   : > { %v4211_v26 = vpack.c.bf16 %v1033_v20, %v1033_v20  ;;  %v3250_v20 = vld [vmem:[#allocation6 + $0xc0] sm:$0xf] }
 0x138   : > { %2000 = vmatpush.bf16.msrb.mxu1 %v3323_v15  ;;  %2013 = vmatpush.bf16.msra.mxu0 %v3419_v18  ;;  %v3732_v15 = vld [vmem:[#allocation6 + $0x38] sm:$0xf0]  ;;  %v3263_v18 = vor.u32 %v3753_v7, %v3262_v19  ;;  %v3243_v19 = vor.u32 %v3746_v56, %v3240_v57 }
 0x139   : > { %1375 = vmatmul.bf16.vlgmr.msra.gmra.mxu2 %v4211_v26  ;;  %1401 = vmatmul.bf16.vlgmr.msrb.gmra.mxu3 %v4211_v26  ;;  %v3776_v57 = vld [vmem:[#allocation6 + $0x19c] sm:$0xf] }
 0x13a   : > { %1986 = vmatpush.bf16.msra.mxu2 %v3239_v24  ;;  %v901_v36 = vpop.f32.mrf.mxu3  ;;  %2032 = vmatpush.bf16.msrb.mxu3 %v3443_v25  ;;  %v3359_v24 = vor.u32 %v3777_v9, %v3358_v8  ;;  %v3228_v8 = vld [vmem:[#allocation6 + $0x9c] sm:$0xf0]  ;;  %v3246_v9 = vld [vmem:[#allocation6 + $0xb0] sm:$0xf] }
 0x13b   : > { %v964_v38 = vpop.f32.mrf.mxu2  ;;  %v3444_v36 = vld [vmem:[#allocation6 + $0x24c] sm:$0xf0] }
 0x13c   : > { %2001 = vmatpush.bf16.msrb.mxu1 %v3311_v29  ;;  %v4215_v41 = vpop.f32.mrf.mxu1  ;;  %2014 = vmatpush.bf16.msra.mxu0 %v3407_v31  ;;  %v965_v6 = vadd.f32 %v964_v38, %v845_v52  ;;  %v3774_v29 = vld [vmem:[#allocation6 + $0x188] sm:$0xf0]  ;;  %v3179_v31 = vor.u32 %v3732_v15, %v3178_v13  ;;  %v3729_v38 = vld [vmem:[#allocation6 + $0x20] sm:$0xf0]  ;;  %v3447_v44 = vor.u32 %v3797_v34, %v3444_v36  ;;  %v3396_v15 = vld [vmem:[#allocation6 + $0x1ec] sm:$0xf0] }
 0x13d   : > { %v3167_v46 = vor.u32 %v3729_v38, %v3166_v32  ;;  %v3411_v13 = vor.u32 %v3788_v63, %v3408_v0  ;;  %v3782_v32 = vld [vmem:[#allocation6 + $0x1cc] sm:$0xf]  ;;  %v3737_v38 = vld [vmem:[#allocation6 + $0x64] sm:$0xf]  ;;  %v3731_v0 = vld [vmem:[#allocation6 + $0x34] sm:$0xf] }
 0x13e   : > { %1987 = vmatpush.bf16.msra.mxu2 %v3227_v37  ;;  %v979_v48 = vpop.f32.mrf.mxu0  ;;  %v978_v25 = vadd.f32 %v4209_v23, %v965_v6  ;;  %v3312_v23 = vld [vmem:[#allocation6 + $0x144] sm:$0xf0]  ;;  %v3288_v6 = vld [vmem:[#allocation6 + $0x114] sm:$0xf0] }
 0x13f   : > { %v3791_v48 = vld [vmem:[#allocation6 + $0x214] sm:$0xf]  ;;  %v3315_v51 = vor.u32 %v3764_v39, %v3312_v23  ;;  %v3752_v39 = vld [vmem:[#allocation6 + $0xdc] sm:$0xf]  ;;  %v3264_v23 = vld [vmem:[#allocation6 + $0xe4] sm:$0xf0] }
 0x140   : > { %2002 = vmatpush.bf16.msrb.mxu1 %v3299_v35  ;;  %2015 = vmatpush.bf16.msra.mxu0 %v3395_v43  ;;  %v1036_v35 = vmax.f32 %v978_v25, 0.0  ;;  %v3435_v43 = vor.u32 %v3794_v22, %v3432_v27  ;;  %v3740_v22 = vld [vmem:[#allocation6 + $0x7c] sm:$0xf]  ;;  %v3276_v25 = vld [vmem:[#allocation6 + $0xfc] sm:$0xf0] }
 0x141   : > { %v3216_v27 = vld [vmem:[#allocation6 + $0x84] sm:$0xf0] }
 0x142   : > { %1988 = vmatpush.bf16.msra.mxu2 %v3215_v49  ;;  %v938_v59 = vpop.f32.mrf.mxu3  ;;  %v3420_v49 = vld [vmem:[#allocation6 + $0x21c] sm:$0xf0]  ;;  %v4230_v58 = vpack.c.bf16 %v1036_v35, %v1036_v35  ;;  %v3219_v36 = vor.u32 %v3740_v22, %v3216_v27  ;;  %v847_v35 = vperm.slane %v4199_v47, 5  ;;  %v3186_v22 = vld [vmem:[#allocation6 + $0x38] sm:$0xf] }
 0x143   : > { %1427 = vmatmul.bf16.vlgmr.msra.gmra.mxu1 %v4211_v26  ;;  %3151 = vmatmul.msk.bf16.vlgmr.msrb.gmra.mxu0 %vm1350_vm4, %v4203_v4  ;;  %v966_v62 = vpop.f32.mrf.mxu2  ;;  %v939_v37 = vadd.f32 %v938_v59, %v844_v10  ;;  %v3748_v10 = vld [vmem:[#allocation6 + $0xb8] sm:$0xf0] }
 0x144   : > { %2003 = vmatpush.bf16.msrb.mxu1 %v3287_v53  ;;  %v953_v2 = vpop.f32.mrf.mxu1  ;;  %2016 = vmatpush.bf16.msra.mxu0 %v3383_v55  ;;  %v3726_v53 = vld [vmem:[#allocation6 + $0x8] sm:$0xf0]  ;;  %v3300_v55 = vld [vmem:[#allocation6 + $0x12c] sm:$0xf0] }
 0x145   : > { %v952_v52 = vadd.f32 %v4215_v41, %v939_v37  ;;  %v3155_v62 = vor.u32 %v3726_v53, %v3154_v50  ;;  %v3303_v41 = vor.u32 %v3761_v54, %v3300_v55  ;;  %v3749_v50 = vld [vmem:[#allocation6 + $0xc4] sm:$0xf]  ;;  %v3210_v53 = vld [vmem:[#allocation6 + $0x68] sm:$0xf]  ;;  %v3739_v54 = vld [vmem:[#allocation6 + $0x70] sm:$0xf0] }
 0x146   : > { %1989 = vmatpush.bf16.msra.mxu2 %v3203_v60  ;;  %v4222_v11 = vpop.f32.mrf.mxu0  ;;  %v3423_v60 = vor.u32 %v3791_v48, %v3420_v49  ;;  %v3734_v49 = vld [vmem:[#allocation6 + $0x4c] sm:$0xf]  ;;  %v3211_v63 = vor.u32 %v3739_v54, %v3210_v53  ;;  %v3807_v53 = vld [vmem:[%s4421_s7 + $0x38] sm:$0xff] }
 0x147   : > { %v1035_v2 = vmax.f32 %v952_v52, 0.0  ;;  %v3192_v52 = vld [vmem:[#allocation6 + $0x54] sm:$0xf0]  ;;  %v1017_v55 = vadd.f32 %v4222_v11, %v847_v35  ;;  %v3402_v35 = vld [vmem:[#allocation6 + $0x1e8] sm:$0xf] }
 0x148   : > { %2004 = vmatpush.bf16.msrb.mxu1 %v3275_v3  ;;  %2017 = vmatpush.bf16.msra.mxu0 %v3371_v5  ;;  %v3758_v5 = vld [vmem:[#allocation6 + $0x10c] sm:$0xf] }
 0x149   : > { %3150 = vmatmul.msk.bf16.vlgmr.msrb.gmra.mxu2 %vm1350_vm4, %v4203_v4  ;;  %1453 = vmatmul.bf16.vlgmr.msra.gmra.mxu3 %v4211_v26  ;;  %v3251_v4 = vor.u32 %v3750_v21, %v3250_v20  ;;  %v3347_v26 = vor.u32 %v3774_v29, %v3346_v28  ;;  %v3291_v16 = vor.u32 %v3758_v5, %v3288_v6  ;;  %v3234_v28 = vld [vmem:[#allocation6 + $0x98] sm:$0xf]  ;;  %v3745_v29 = vld [vmem:[#allocation6 + $0xa0] sm:$0xf0] }
 0x14a   : > { %1990 = vmatpush.bf16.msra.mxu2 %v3191_v12  ;;  %v940_v30 = vpop.f32.mrf.mxu3  ;;  %2051 = vmatpush.bf16.msra.mxu3 %v3339_v14  ;;  %v3785_v14 = vld [vmem:[#allocation6 + $0x1e4] sm:$0xf]  ;;  %v4233_v17 = vpack.c.bf16 %v1035_v2, %v1035_v2  ;;  %v3231_v20 = vor.u32 %v3743_v1, %v3228_v8  ;;  %v3247_v21 = vor.u32 %v3748_v10, %v3246_v9  ;;  %v3796_v1 = vld [vmem:[#allocation6 + $0x238] sm:$0xf0]  ;;  %v3180_v2 = vld [vmem:[#allocation6 + $0x3c] sm:$0xf0] }
 0x14b   : > { %v3399_v30 = vor.u32 %v3785_v14, %v3396_v15  ;;  %v3235_v37 = vor.u32 %v3745_v29, %v3234_v28  ;;  %v3773_v6 = vld [vmem:[#allocation6 + $0x184] sm:$0xf]  ;;  %v3348_v8 = vld [vmem:[#allocation6 + $0x18c] sm:$0xf0]  ;;  %v3728_v9 = vld [vmem:[#allocation6 + $0x1c] sm:$0xf] }
 0x14c   : > { %2005 = vmatpush.bf16.msrb.mxu1 %v3263_v18  ;;  %v990_v40 = vpop.f32.mrf.mxu1  ;;  %2018 = vmatpush.bf16.msra.mxu0 %v3359_v24  ;;  %v3755_v24 = vld [vmem:[#allocation6 + $0xf4] sm:$0xf]  ;;  %v3426_v10 = vld [vmem:[#allocation6 + $0x218] sm:$0xf]  ;;  %v3793_v15 = vld [vmem:[#allocation6 + $0x220] sm:$0xf0] }
 0x14d   : > { %v991_v59 = vadd.f32 %v990_v40, %v846_v42  ;;  %v3279_v34 = vor.u32 %v3755_v24, %v3276_v25  ;;  %v3204_v40 = vld [vmem:[#allocation6 + $0x6c] sm:$0xf0]  ;;  %v3733_v24 = vld [vmem:[#allocation6 + $0x40] sm:$0xf0]  ;;  %v3351_v25 = vor.u32 %v3773_v6, %v3348_v8  ;;  %v3427_v28 = vor.u32 %v3793_v15, %v3426_v10  ;;  %v3775_v8 = vld [vmem:[#allocation6 + $0x190] sm:$0xf0] }
 0x14e   : > { %1991 = vmatpush.bf16.msra.mxu2 %v3179_v31  ;;  %v1018_v45 = vpop.f32.mrf.mxu0  ;;  %2052 = vmatpush.bf16.msra.mxu3 %v3327_v33  ;;  %v3384_v33 = vld [vmem:[#allocation6 + $0x1d4] sm:$0xf0]  ;;  %v3270_v15 = vld [vmem:[#allocation6 + $0xe0] sm:$0xf] }
 0x14f   : > { %v3387_v42 = vor.u32 %v3782_v32, %v3384_v33  ;;  %v3267_v45 = vor.u32 %v3752_v39, %v3264_v23  ;;  %v3725_v32 = vld [vmem:[#allocation6 + $0x4] sm:$0xf]  ;;  %v3414_v33 = vld [vmem:[#allocation6 + $0x200] sm:$0xf]  ;;  %v3342_v39 = vld [vmem:[#allocation6 + $0x170] sm:$0xf] }
 0x150   : > { %2006 = vmatpush.bf16.msrb.mxu1 %v3251_v4  ;;  %2019 = vmatpush.bf16.msra.mxu0 %v3347_v26  ;;  %v3222_v4 = vld [vmem:[#allocation6 + $0x80] sm:$0xf]  ;;  %v3742_v26 = vld [vmem:[#allocation6 + $0x88] sm:$0xf0]  ;;  %v3772_v23 = vld [vmem:[#allocation6 + $0x178] sm:$0xf0] }
 0x151   : > { %v3223_v48 = vor.u32 %v3742_v26, %v3222_v4  ;;  %v3282_v10 = vld [vmem:[#allocation6 + $0xf8] sm:$0xf] }
 0x152   : > { %1992 = vmatpush.bf16.msra.mxu2 %v3167_v46  ;;  %v1003_v61 = vpop.f32.mrf.mxu3  ;;  %2053 = vmatpush.bf16.msra.mxu3 %v3315_v51  ;;  %v3207_v46 = vor.u32 %v3737_v38, %v3204_v40  ;;  %v3252_v51 = vld [vmem:[#allocation6 + $0xcc] sm:$0xf0]  ;;  %v3730_v38 = vld [vmem:[#allocation6 + $0x28] sm:$0xf0] }
 0x153   : > { %v1004_v3 = vadd.f32 %v1003_v61, %v991_v59  ;;  %2007 = vmatmul.bf16.vlgmr.msrb.gmra.mxu1 %v4230_v58  ;;  %v3360_v59 = vld [vmem:[#allocation6 + $0x1a4] sm:$0xf0] }
 0x154   : > { %2064 = vmatpush.bf16.msra.mxu1 %v3435_v43  ;;  %2084 = vmatpush.bf16.msrb.mxu0 %v3447_v44  ;;  %v992_v7 = vpop.f32.mrf.mxu1  ;;  %v3779_v43 = vld [vmem:[#allocation6 + $0x1b4] sm:$0xf]  ;;  %v3372_v44 = vld [vmem:[#allocation6 + $0x1bc] sm:$0xf0]  ;;  %v3363_v11 = vor.u32 %v3776_v57, %v3360_v59  ;;  %v3806_v57 = vld [vmem:[%s4421_s7 + $0x30] sm:$0xff] }
 0x155   : > { %v1037_v12 = vmax.f32 %v1004_v3, 0.0  ;;  %v3375_v47 = vor.u32 %v3779_v43, %v3372_v44  ;;  %v3198_v3 = vld [vmem:[#allocation6 + $0x50] sm:$0xf]  ;;  %v3343_v43 = vor.u32 %v3772_v23, %v3342_v39  ;;  %v3162_v44 = vld [vmem:[#allocation6 + $0x8] sm:$0xf] }
 0x156   : > { %1993 = vmatpush.bf16.msra.mxu2 %v3155_v62  ;;  %2054 = vmatpush.bf16.msra.mxu3 %v3303_v41  ;;  %v3195_v62 = vor.u32 %v3734_v49, %v3192_v52  ;;  %v3438_v41 = vld [vmem:[#allocation6 + $0x230] sm:$0xf]  ;;  %v3784_v52 = vld [vmem:[#allocation6 + $0x1d8] sm:$0xf0]  ;;  %v3820_v23 = vld [vmem:[%s4421_s7 + $0xa0] sm:$0xff] }
 0x157   : > { %v4235_v18 = vpack.c.bf16 %v1037_v12, %v1037_v12  ;;  %v3439_v7 = vor.u32 %v3796_v1, %v3438_v41  ;;  %v3763_v41 = vld [vmem:[#allocation6 + $0x130] sm:$0xf0] }
 0x158   : > { %2065 = vmatpush.bf16.msra.mxu1 %v3423_v60  ;;  %v3255_v60 = vor.u32 %v3749_v50, %v3252_v51  ;;  %v3390_v51 = vld [vmem:[#allocation6 + $0x1d0] sm:$0xf] }
 0x159   : > { %1994 = vmatmul.bf16.vlgmr.msra.gmra.mxu2 %v4233_v17  ;;  %2020 = vmatmul.bf16.vlgmr.msra.gmra.mxu0 %v4235_v18  ;;  %v3391_v59 = vor.u32 %v3784_v52, %v3390_v51  ;;  %v3829_v39 = vld [vmem:[%s4421_s7 + $0xe8] sm:$0xff]  ;;  %v3824_v51 = vld [vmem:[%s4421_s7 + $0xc0] sm:$0xff] }
 0x15a   : > { %2038 = vmatpush.bf16.msrb.mxu2 %v3243_v19  ;;  %v1005_v31 = vpop.f32.mrf.mxu3  ;;  %2055 = vmatpush.bf16.msra.mxu3 %v3291_v16  ;;  %v3736_v19 = vld [vmem:[#allocation6 + $0x58] sm:$0xf0]  ;;  %v3450_v16 = vld [vmem:[#allocation6 + $0x248] sm:$0xf]  ;;  %v432_v52 = vld [vmem:[%s4424_s10 + $0x8] sm:$0xf] }
 0x15b   : > { %2090 = vmatpush.bf16.msra.mxu0 %v3247_v21  ;;  %v3199_v14 = vor.u32 %v3736_v19, %v3198_v3  ;;  %v3168_v21 = vld [vmem:[#allocation6 + $0x24] sm:$0xf0]  ;;  %v3187_v31 = vor.u32 %v3733_v24, %v3186_v22  ;;  %v3778_v3 = vld [vmem:[#allocation6 + $0x1a8] sm:$0xf0]  ;;  %v3751_v22 = vld [vmem:[#allocation6 + $0xd0] sm:$0xf0] }
 0x15c   : > { %2066 = vmatpush.bf16.msra.mxu1 %v3411_v13  ;;  %v3183_v13 = vor.u32 %v3731_v0, %v3180_v2  ;;  %v3306_v0 = vld [vmem:[#allocation6 + $0x128] sm:$0xf]  ;;  %v3366_v2 = vld [vmem:[#allocation6 + $0x1a0] sm:$0xf] }
 0x15d   : > { %v3307_v19 = vor.u32 %v3763_v41, %v3306_v0  ;;  %v3367_v6 = vor.u32 %v3778_v3, %v3366_v2 }
 0x15e   : > { %2039 = vmatpush.bf16.msrb.mxu2 %v3231_v20  ;;  %2056 = vmatpush.bf16.msra.mxu3 %v3279_v34  ;;  %v3799_v20 = vld [vmem:[#allocation6 + $0x250] sm:$0xf0]  ;;  %v3790_v34 = vld [vmem:[#allocation6 + $0x208] sm:$0xf0] }
 0x15f   : > { %2091 = vmatpush.bf16.msra.mxu0 %v3235_v37  ;;  %v3451_v29 = vor.u32 %v3799_v20, %v3450_v16  ;;  %v3174_v37 = vld [vmem:[#allocation6 + $0x20] sm:$0xf]  ;;  %v3415_v40 = vor.u32 %v3790_v34, %v3414_v33  ;;  %v3754_v16 = vld [vmem:[#allocation6 + $0xe8] sm:$0xf0]  ;;  %v3810_v33 = vld [vmem:[%s4421_s7 + $0x50] sm:$0xff] }
 0x160   : > { %2067 = vmatpush.bf16.msra.mxu1 %v3399_v30  ;;  %v3171_v30 = vor.u32 %v3728_v9, %v3168_v21  ;;  %v3175_v26 = vor.u32 %v3730_v38, %v3174_v37  ;;  %v3271_v20 = vor.u32 %v3754_v16, %v3270_v15  ;;  %v3258_v21 = vld [vmem:[#allocation6 + $0xc8] sm:$0xf]  ;;  %v3830_v34 = vld [vmem:[%s4421_s7 + $0xf0] sm:$0xff]  ;;  %v3801_v37 = vld [vmem:[%s4421_s7 + $0x8] sm:$0xff]  ;;  %v1344_v16 = vperm.slane %v432_v52, 2 }
 0x161   : > { %v3259_v24 = vor.u32 %v3751_v22, %v3258_v21  ;;  %v3809_v38 = vld [vmem:[%s4421_s7 + $0x48] sm:$0xff] }
 0x162   : > { %2040 = vmatpush.bf16.msrb.mxu2 %v3219_v36  ;;  %v1029_v56 = vpop.f32.mrf.mxu3  ;;  %2057 = vmatpush.bf16.msra.mxu3 %v3267_v45  ;;  %v3156_v36 = vld [vmem:[#allocation6 + $0xc] sm:$0xf0]  ;;  %v3727_v45 = vld [vmem:[#allocation6 + $0x10] sm:$0xf0] }
 0x163   : > { %v1030_v61 = vadd.f32 %v1029_v56, %v1017_v55  ;;  %2092 = vmatpush.bf16.msra.mxu0 %v3223_v48  ;;  %v3159_v4 = vor.u32 %v3725_v32, %v3156_v36  ;;  %v3769_v48 = vld [vmem:[#allocation6 + $0x160] sm:$0xf0]  ;;  %v3163_v50 = vor.u32 %v3727_v45, %v3162_v44  ;;  %v3766_v56 = vld [vmem:[#allocation6 + $0x148] sm:$0xf0]  ;;  %v3822_v32 = vld [vmem:[%s4421_s7 + $0xb0] sm:$0xff] }
 0x164   : > { %2068 = vmatpush.bf16.msra.mxu1 %v3387_v42  ;;  %v3787_v42 = vld [vmem:[#allocation6 + $0x1f0] sm:$0xf0]  ;;  %v3815_v55 = vld [vmem:[%s4421_s7 + $0x78] sm:$0xff]  ;;  %v3826_v44 = vld [vmem:[%s4421_s7 + $0xd0] sm:$0xff] }
 0x165   : > { %v1038_v5 = vmax.f32 %v1030_v61, 0.0  ;;  %v3403_v49 = vor.u32 %v3787_v42, %v3402_v35  ;;  %v3781_v61 = vld [vmem:[#allocation6 + $0x1c0] sm:$0xf0]  ;;  %v3821_v36 = vld [vmem:[%s4421_s7 + $0xa8] sm:$0xff] }
 0x166   : > { %2041 = vmatpush.bf16.msrb.mxu2 %v3207_v46  ;;  %2058 = vmatpush.bf16.msra.mxu3 %v3255_v60  ;;  %v3330_v46 = vld [vmem:[#allocation6 + $0x158] sm:$0xf]  ;;  %v3819_v35 = vld [vmem:[%s4421_s7 + $0x98] sm:$0xff]  ;;  %v3817_v45 = vld [vmem:[%s4421_s7 + $0x88] sm:$0xff] }
 0x167   : > { %v4241_v12 = vpack.c.bf16 %v1038_v5, %v1038_v5  ;;  %2093 = vmatpush.bf16.msra.mxu0 %v3211_v63  ;;  %v3331_v54 = vor.u32 %v3769_v48, %v3330_v46  ;;  %v3378_v60 = vld [vmem:[#allocation6 + $0x1b8] sm:$0xf]  ;;  %v3294_v5 = vld [vmem:[#allocation6 + $0x110] sm:$0xf]  ;;  %v3827_v42 = vld [vmem:[%s4421_s7 + $0xd8] sm:$0xff] }
 0x168   : > { %2069 = vmatpush.bf16.msra.mxu1 %v3375_v47  ;;  %v3318_v47 = vld [vmem:[#allocation6 + $0x140] sm:$0xf]  ;;  %v3814_v63 = vld [vmem:[%s4421_s7 + $0x70] sm:$0xff]  ;;  %v3379_v1 = vor.u32 %v3781_v61, %v3378_v60  ;;  %v3825_v46 = vld [vmem:[%s4421_s7 + $0xc8] sm:$0xff] }
 0x169   : > { %3452 = vmatmul.msk.bf16.vlgmr.msrb.gmra.mxu3 %vm1982_vm5, %v4241_v12  ;;  %3453 = vmatmul.msk.bf16.vlgmr.msrb.gmra.mxu0 %vm1982_vm5, %v4241_v12 }
 0x16a   : > { %2042 = vmatpush.bf16.msrb.mxu2 %v3195_v62  ;;  %v1031_v27 = vpop.f32.mrf.mxu3  ;;  %2116 = vmatpush.bf16.msrb.mxu3 %v3439_v7  ;;  %v3319_v62 = vor.u32 %v3766_v56, %v3318_v47  ;;  %v3354_v7 = vld [vmem:[#allocation6 + $0x188] sm:$0xf]  ;;  %v1343_v47 = vperm.slane %v432_v52, 1 }
 0x16b   : > { %2094 = vmatpush.bf16.msra.mxu0 %v3199_v14  ;;  %v3823_v27 = vld [vmem:[%s4421_s7 + $0xb8] sm:$0xff]  ;;  %v2142_v56 = vld [vmem:[%s4420_s6] sm:$0xff] }
 0x16c   : > { %2070 = vmatpush.bf16.msra.mxu1 %v3363_v11  ;;  %v3760_v11 = vld [vmem:[#allocation6 + $0x118] sm:$0xf0]  ;;  %v2147_v2 = vunpack.c.h.bf16 %v2142_v56 }
 0x16d   : > { %v3295_v9 = vor.u32 %v3760_v11, %v3294_v5 }
 0x16e   : > { %2043 = vmatpush.bf16.msrb.mxu2 %v3183_v13  ;;  %2117 = vmatpush.bf16.msrb.mxu3 %v3427_v28  ;;  %v3355_v13 = vor.u32 %v3775_v8, %v3354_v7  ;;  %v3812_v28 = vld [vmem:[%s4421_s7 + $0x60] sm:$0xff] }
 0x16f   : > { %2095 = vmatpush.bf16.msra.mxu0 %v3187_v31  ;;  %v3831_v31 = vld [vmem:[%s4421_s7 + $0xf8] sm:$0xff] }
 0x170   : > { %2071 = vmatpush.bf16.msra.mxu1 %v3351_v25  ;;  %v3813_v25 = vld [vmem:[%s4421_s7 + $0x68] sm:$0xff] }
 0x172   : > { %2044 = vmatpush.bf16.msrb.mxu2 %v3171_v30  ;;  %2118 = vmatpush.bf16.msrb.mxu3 %v3415_v40  ;;  %v3811_v30 = vld [vmem:[%s4421_s7 + $0x58] sm:$0xff]  ;;  %v3800_v40 = vld [vmem:[%s4421_s7] sm:$0xff] }
 0x173   : > { %2072 = vmatmul.bf16.vlgmr.msra.gmra.mxu1 %v4235_v18  ;;  %2096 = vmatpush.bf16.msra.mxu0 %v3175_v26  ;;  %v3828_v26 = vld [vmem:[%s4421_s7 + $0xe0] sm:$0xff] }
 0x174   : > { %2136 = vmatpush.bf16.msrb.mxu1 %v3451_v29  ;;  %v3803_v29 = vld [vmem:[%s4421_s7 + $0x18] sm:$0xff] }
 0x176   : > { %2045 = vmatpush.bf16.msrb.mxu2 %v3159_v4  ;;  %2119 = vmatpush.bf16.msrb.mxu3 %v3403_v49  ;;  %v3808_v4 = vld [vmem:[%s4421_s7 + $0x40] sm:$0xff] }
 0x177   : > { %2097 = vmatpush.bf16.msra.mxu0 %v3163_v50  ;;  %v3816_v50 = vld [vmem:[%s4421_s7 + $0x80] sm:$0xff] }
 0x178   : > { %2426 = vmatpush.bf16.msra.mxu1 %v3807_v53 }
 0x179   : > { %2046 = vmatmul.bf16.vlgmr.msrb.gmra.mxu2 %v4233_v17  ;;  %2059 = vmatmul.bf16.vlgmr.msra.gmra.mxu3 %v4230_v58 }
 0x17a   : > { %2103 = vmatpush.bf16.msra.mxu2 %v3343_v43  ;;  %2098 = vmatmul.bf16.vlgmr.msra.gmra.mxu0 %v4233_v17  ;;  %v3757_v17 = vld [vmem:[#allocation6 + $0x100] sm:$0xf0]  ;;  %v3818_v43 = vld [vmem:[%s4421_s7 + $0x90] sm:$0xff] }
 0x17b   : > { %2440 = vmatpush.bf16.msrb.mxu0 %v3815_v55  ;;  %2120 = vmatpush.bf16.msrb.mxu3 %v3391_v59  ;;  %v3283_v14 = vor.u32 %v3757_v17, %v3282_v10  ;;  %v1342_v55 = vperm.slane %v432_v52, 0 }
 0x17c   : > { %2427 = vmatpush.bf16.msra.mxu1 %v3806_v57  ;;  %v2144_v57 = vld [vmem:[%s4420_s6 + $0x10] sm:$0xff] }
 0x17d   : > { %v2150_v0 = vunpack.c.l.bf16 %v2144_v57  ;;  %v2151_v3 = vunpack.c.h.bf16 %v2144_v57 }
 0x17e   : > { %2104 = vmatpush.bf16.msra.mxu2 %v3331_v54 }
 0x17f   : > { %2441 = vmatpush.bf16.msrb.mxu0 %v3814_v63  ;;  %2121 = vmatpush.bf16.msrb.mxu3 %v3379_v1  ;;  %v2146_v63 = vunpack.c.l.bf16 %v2142_v56 }
 0x182   : > { %2105 = vmatpush.bf16.msra.mxu2 %v3319_v62 }
 0x183   : > { %3454 = vmatmul.msk.bf16.vlgmr.msrb.gmra.mxu1 %vm1982_vm5, %v4241_v12  ;;  %2122 = vmatpush.bf16.msrb.mxu3 %v3367_v6  ;;  %v3805_v12 = vld [vmem:[%s4421_s7 + $0x28] sm:$0xff] }
 0x184   : > { %2428 = vmatpush.bf16.msra.mxu1 %v3805_v12  ;;  %2442 = vmatpush.bf16.msrb.mxu0 %v3813_v25  ;;  %v2143_v12 = vld [vmem:[%s4420_s6 + $0x8] sm:$0xff]  ;;  %v2145_v25 = vld [vmem:[%s4420_s6 + $0x18] sm:$0xff] }
 0x186   : > { %2106 = vmatpush.bf16.msra.mxu2 %v3307_v19 }
 0x187   : > { %2123 = vmatpush.bf16.msrb.mxu3 %v3355_v13 }
 0x188   : > { %2443 = vmatpush.bf16.msrb.mxu0 %v3812_v28 }
 0x18a   : > { %2107 = vmatpush.bf16.msra.mxu2 %v3295_v9  ;;  %2124 = vmatmul.bf16.vlgmr.msrb.gmra.mxu3 %v4235_v18  ;;  %v3804_v18 = vld [vmem:[%s4421_s7 + $0x20] sm:$0xff] }
 0x18b   : > { %2429 = vmatpush.bf16.msra.mxu1 %v3804_v18  ;;  %2468 = vmatpush.bf16.msra.mxu3 %v3831_v31  ;;  %v2152_v31 = vunpack.c.l.bf16 %v2145_v25 }
 0x18c   : > { %2444 = vmatpush.bf16.msrb.mxu0 %v3811_v30  ;;  %v2148_v30 = vunpack.c.l.bf16 %v2143_v12 }
 0x18e   : > { %2108 = vmatpush.bf16.msra.mxu2 %v3283_v14 }
 0x18f   : > { %2430 = vmatpush.bf16.msra.mxu1 %v3803_v29  ;;  %2469 = vmatpush.bf16.msra.mxu3 %v3830_v34 }
 0x190   : > { %2445 = vmatpush.bf16.msrb.mxu0 %v3810_v33 }
 0x192   : > { %2109 = vmatpush.bf16.msra.mxu2 %v3271_v20  ;;  %v3839_v20 = vld [vmem:[%s4423_s9 + $0x38] sm:$0xff] }
 0x193   : > { %2470 = vmatpush.bf16.msra.mxu3 %v3829_v39 }
 0x194   : > { %2446 = vmatpush.bf16.msrb.mxu0 %v3809_v38  ;;  %v3837_v38 = vld [vmem:[%s4423_s9 + $0x28] sm:$0xff] }
 0x196   : > { %2110 = vmatpush.bf16.msra.mxu2 %v3259_v24  ;;  %v1345_v24 = vperm.slane %v432_v52, 3  ;;  %v3835_v52 = vld [vmem:[%s4423_s9 + $0x18] sm:$0xff] }
 0x197   : > { %2471 = vmatpush.bf16.msra.mxu3 %v3828_v26 }
 0x198   : > { %2447 = vmatpush.bf16.msrb.mxu0 %v3808_v4 }
 0x199   : > { %2111 = vmatmul.bf16.vlgmr.msra.gmra.mxu2 %v4230_v58  ;;  %v3802_v58 = vld [vmem:[%s4421_s7 + $0x10] sm:$0xff] }
 0x19a   : > { %2454 = vmatpush.bf16.msrb.mxu2 %v3823_v27  ;;  %2431 = vmatpush.bf16.msra.mxu1 %v3802_v58  ;;  %v3838_v58 = vld [vmem:[%s4423_s9 + $0x30] sm:$0xff] }
 0x19b   : > { %2472 = vmatpush.bf16.msra.mxu3 %v3827_v42 }
 0x19e   : > { %2455 = vmatpush.bf16.msrb.mxu2 %v3822_v32  ;;  %2432 = vmatpush.bf16.msra.mxu1 %v3801_v37  ;;  %v2153_v37 = vunpack.c.h.bf16 %v2145_v25 }
 0x19f   : > { %2473 = vmatpush.bf16.msra.mxu3 %v3826_v44 }
 0x1a2   : > { %2456 = vmatpush.bf16.msrb.mxu2 %v3821_v36  ;;  %2433 = vmatpush.bf16.msra.mxu1 %v3800_v40  ;;  %v2149_v36 = vunpack.c.h.bf16 %v2143_v12 }
 0x1a3   : > { %2474 = vmatpush.bf16.msra.mxu3 %v3825_v46  ;;  %v3836_v46 = vld [vmem:[%s4423_s9 + $0x20] sm:$0xff] }
 0x1a6   : > { %2457 = vmatpush.bf16.msrb.mxu2 %v3820_v23  ;;  %2561 = vmatpush.bf16.msrb.mxu1 %v3839_v20 }
 0x1a7   : > { %2475 = vmatpush.bf16.msra.mxu3 %v3824_v51 }
 0x1aa   : > { %2458 = vmatpush.bf16.msrb.mxu2 %v3819_v35  ;;  %2562 = vmatpush.bf16.msrb.mxu1 %v3838_v58 }
 0x1ae   : > { %2459 = vmatpush.bf16.msrb.mxu2 %v3818_v43  ;;  %2563 = vmatpush.bf16.msrb.mxu1 %v3837_v38 }
 0x1b0   : > { %v1389_v48 = vpop.f32.mrf.mxu1  ;;  %v1415_v49 = vpop.f32.mrf.mxu0 }
 0x1b2   : > { %2460 = vmatpush.bf16.msrb.mxu2 %v3817_v45  ;;  %2564 = vmatpush.bf16.msrb.mxu1 %v3836_v46 }
 0x1b6   : > { %2461 = vmatpush.bf16.msrb.mxu2 %v3816_v50  ;;  %2565 = vmatpush.bf16.msrb.mxu1 %v3835_v52 }
 0x1b8   : > { %v1391_v53 = vpop.f32.mrf.mxu1  ;;  %v1417_v54 = vpop.f32.mrf.mxu0 }
 0x1bc   : > { %v1376_v59 = vpop.f32.mrf.mxu2  ;;  %v1402_v60 = vpop.f32.mrf.mxu3 }
 0x1bd   : > { %v1377_v61 = vadd.f32 %v1376_v59, %v1342_v55  ;;  %v1403_v62 = vadd.f32 %v1402_v60, %v1343_v47  ;;  %v3834_v55 = vld [vmem:[%s4423_s9 + $0x10] sm:$0xff]  ;;  %v3833_v59 = vld [vmem:[%s4423_s9 + $0x8] sm:$0xff] }
 0x1be   : > { %2566 = vmatpush.bf16.msrb.mxu1 %v3834_v55 }
 0x1bf   : > { %v1390_v41 = vadd.f32 %v1389_v48, %v1377_v61  ;;  %v1416_v1 = vadd.f32 %v1415_v49, %v1403_v62  ;;  %v433_v48 = vld [vmem:[%s4424_s10 + $0xc] sm:$0x7]  ;;  %v3832_v61 = vld [vmem:[%s4423_s9] sm:$0xff] }
 0x1c0   : > { %v1428_v19 = vpop.f32.mrf.mxu1  ;;  %v1467_v5 = vpop.f32.mrf.mxu0  ;;  %v1976_v51 = vperm.slane %v433_v48, 0 }
 0x1c1   : > { %v2154_v11 = vperm.slane %v1390_v41, 0  ;;  %v2155_v6 = vperm.slane %v1416_v1, 0  ;;  %v1429_v27 = vadd.f32 %v1428_v19, %v1344_v16 }
 0x1c2   : > { %2567 = vmatpush.bf16.msrb.mxu1 %v3833_v59 }
 0x1c3   : > { %v2158_v7 = vmul.f32 %v2154_v11, %v2146_v63  ;;  %v2162_v8 = vmul.f32 %v2154_v11, %v2150_v0  ;;  %v2159_v9 = vmul.f32 %v2155_v6, %v2147_v2  ;;  %v2163_v10 = vmul.f32 %v2155_v6, %v2151_v3 }
 0x1c4   : > { %v1378_v17 = vpop.f32.mrf.mxu2  ;;  %v1404_v13 = vpop.f32.mrf.mxu3  ;;  %v1978_v3 = vperm.slane %v433_v48, 2  ;;  %v1977_v11 = vperm.slane %v433_v48, 1 }
 0x1c5   : > { %v2230_v14 = vpack.c.bf16 %v2162_v8, %v2158_v7  ;;  %v2231_v15 = vpack.c.bf16 %v2163_v10, %v2159_v9  ;;  %v3841_v13 = vld [vmem:[%s4422_s8] sm:$0xff]  }
 0x1c6   : > { %2568 = vmatpush.bf16.msrb.mxu1 %v3832_v61 }
 0x1c7   : > { %2434 = vmatmul.bf16.vlgmr.msra.gmra.mxu1 %v2230_v14  ;;  %2448 = vmatmul.bf16.vlgmr.msrb.gmra.mxu0 %v2231_v15 }
 0x1c8   : > { %v1430_v21 = vpop.f32.mrf.mxu1  ;;  %v1469_v22 = vpop.f32.mrf.mxu0 }
 0x1c9   : > { %v3842_v21 = vunpack.c.l.bf16 %v3841_v13  ;;  %v3843_v22 = vunpack.c.h.bf16 %v3841_v13 }
 0x1cc   : > { %v1441_v18 = vpop.f32.mrf.mxu2  ;;  %v1454_v28 = vpop.f32.mrf.mxu3 }
 0x1cd   : > { %v1442_v29 = vadd.f32 %v1441_v18, %v1429_v27  ;;  %v1455_v32 = vadd.f32 %v1454_v28, %v1345_v24 }
 0x1cf   : > { %v2156_v33 = vperm.slane %v1442_v29, 0  ;;  %v1468_v34 = vadd.f32 %v1467_v5, %v1455_v32 }
 0x1d0   : > { %v2008_v39 = vpop.f32.mrf.mxu1 }
 0x1d1   : > { %v2160_v23 = vmul.f32 %v2156_v33, %v2148_v30  ;;  %v2164_v40 = vmul.f32 %v2156_v33, %v2152_v31  ;;  %v2157_v4 = vperm.slane %v1468_v34, 0  ;;  %v3848_v30 = vld [vmem:[%s4422_s8 + $0x8] sm:$0xff]  }
 0x1d2   : > { %v3846_v31 = vunpack.c.l.bf16 %v3848_v30  ;;  %v3847_v32 = vunpack.c.h.bf16 %v3848_v30 }
 0x1d3   : > { %v2232_v26 = vpack.c.bf16 %v2164_v40, %v2160_v23  ;;  %v2161_v35 = vmul.f32 %v2157_v4, %v2149_v36  ;;  %v2165_v42 = vmul.f32 %v2157_v4, %v2153_v37 }
 0x1d4   : > { %v1443_v43 = vpop.f32.mrf.mxu2  ;;  %v1456_v44 = vpop.f32.mrf.mxu3 }
 0x1d5   : > { %v2233_v45 = vpack.c.bf16 %v2165_v42, %v2161_v35  ;;  %2462 = vmatmul.bf16.vlgmr.msrb.gmra.mxu2 %v2232_v26 }
 0x1d6   : > { %v2021_v49 = vpop.f32.mrf.mxu0 }
 0x1d7   : > { %2476 = vmatmul.bf16.vlgmr.msra.gmra.mxu3 %v2233_v45 }
 0x1d8   : > { %v2010_v50 = vpop.f32.mrf.mxu1 }
 0x1dc   : > { %v1995_v53 = vpop.f32.mrf.mxu2 }
 0x1dd   : > { %v1996_v54 = vadd.f32 %v1995_v53, %v1976_v51 }
 0x1de   : > { %v2023_v56 = vpop.f32.mrf.mxu0 }
 0x1df   : > { %v2009_v47 = vadd.f32 %v2008_v39, %v1996_v54  ;;  %v2580_v54 = vld [vmem:[%s4414_s0] sm:$0xff] }
 0x1e1   : > { %v2022_v57 = vadd.f32 %v2021_v49, %v2009_v47  ;;  %v2581_v47 = vpack.c.bf16 %v2580_v54, %v2580_v54 }
 0x1e4   : > { %v1997_v60 = vpop.f32.mrf.mxu2 }
 0x1e6   : > { %v2086_v62 = vpop.f32.mrf.mxu0 }
 0x1ec   : > { %v2034_v63 = vpop.f32.mrf.mxu3 }
 0x1ed   : > { %v4393_v0 = vadd.f32 %v2034_v63, %v2022_v57 }
 0x1ee   : > { %v2088_v1 = vpop.f32.mrf.mxu0 }
 0x1ef   : > { %v2583_v63 = vperm.slane %v4393_v0, 0 }
 0x1f0   : > { %v2073_v41 = vpop.f32.mrf.mxu1 }
 0x1f4   : > { %v2036_v2 = vpop.f32.mrf.mxu3 }
 0x1f7   : > { %v2099_v5 = vpop.f32.mrf.mxu0 }
 0x1f8   : > { %v2075_v19 = vpop.f32.mrf.mxu1  ;;  %v2100_v6 = vadd.f32 %v2099_v5, %v1978_v3 }
 0x1fc   : > { %v2047_v7 = vpop.f32.mrf.mxu2  ;;  %v2060_v9 = vpop.f32.mrf.mxu3 }
 0x1fd   : > { %v2048_v8 = vadd.f32 %v2047_v7, %v1977_v11 }
 0x1ff   : > { %v2061_v10 = vadd.f32 %v2060_v9, %v2048_v8  ;;  %v2101_v15 = vpop.f32.mrf.mxu0 }
 0x200   : > { %v2138_v17 = vpop.f32.mrf.mxu1 }
 0x201   : > { %v2074_v14 = vadd.f32 %v2073_v41, %v2061_v10 }
 0x203   : > { %v2087_v16 = vadd.f32 %v2086_v62, %v2074_v14 }
 0x204   : > { %v2049_v20 = vpop.f32.mrf.mxu2  ;;  %v2062_v12 = vpop.f32.mrf.mxu3 }
 0x205   : > { %v2490_v24 = vperm.slane %v2087_v16, 0 }
 0x207   : > { %v2491_v27 = vmul.f32 %v3842_v21, %v2490_v24  ;;  %v2492_v18 = vmul.f32 %v3843_v22, %v2490_v24  ;;  %v2493_v58 = vmul.f32 %v3846_v31, %v2490_v24  ;;  %v2494_v33 = vmul.f32 %v3847_v32, %v2490_v24 }
 0x208   : > { %v2140_v25 = vpop.f32.mrf.mxu1 }
 0x209   : > { %v2511_v28 = vpack.c.bf16 %v2492_v18, %v2491_v27  ;;  %v2512_v38 = vpack.c.bf16 %v2494_v33, %v2493_v58 }
 0x20b   : > { %2569 = vmatmul.bf16.vlgmr.msrb.gmra.mxu1 %v2511_v28 }
 0x20d   : > { %v2125_v29 = vpop.f32.mrf.mxu3 }
 0x215   : > { %v2127_v34 = vpop.f32.mrf.mxu3 }
 0x21b   : > { %2574 = vmatmul.bf16.gmra.mxu1 %v2512_v38 }
 0x21c   : > { %v2112_v36 = vpop.f32.mrf.mxu2 }
 0x21d   : > { %v2113_v37 = vadd.f32 %v2112_v36, %v2100_v6 }
 0x21f   : > { %v2126_v39 = vadd.f32 %v2125_v29, %v2113_v37 }
 0x221   : > { %v2139_v23 = vadd.f32 %v2138_v17, %v2126_v39 }
 0x223   : > { %v2604_v5 = vperm.slane %v2139_v23, 0 }
 0x224   : > { %v2114_v40 = vpop.f32.mrf.mxu2 }
 0x244   : > { %v2435_v4 = vpop.f32.mrf.mxu1  ;;  %v2449_v26 = vpop.f32.mrf.mxu0 }
 0x245   : > { %v2450_v45 = vadd.f32 %v2449_v26, %v2435_v4 }
 0x24c   : > { %v2437_v43 = vpop.f32.mrf.mxu1  ;;  %v2451_v44 = vpop.f32.mrf.mxu0 }
 0x24d   : > { %v2452_v46 = vadd.f32 %v2451_v44, %v2437_v43 }
 0x258   : > { %v2463_v35 = vpop.f32.mrf.mxu2 }
 0x259   : > { %v2464_v48 = vadd.f32 %v2463_v35, %v2450_v45 }
 0x25a   : > { %v2477_v42 = vpop.f32.mrf.mxu3 }
 0x25b   : > { %v2478_v52 = vadd.f32 %v2477_v42, %v2464_v48 }
 0x260   : > { %v2465_v49 = vpop.f32.mrf.mxu2 }
 0x261   : > { %v2466_v50 = vadd.f32 %v2465_v49, %v2452_v46 }
 0x262   : > { %v2479_v51 = vpop.f32.mrf.mxu3 }
 0x263   : > { %v2480_v53 = vadd.f32 %v2479_v51, %v2466_v50 }
 0x265   : > { %v2582_v55 = vpack.c.bf16 %v2480_v53, %v2478_v52 }
 0x267   : > { %2594 = vmatpush.bf16.msra.mxu0 %v2582_v55 }
 0x26a   : > { %3615 = vmatmul.msk.bf16.vlgmr.msra.gmra.mxu0 %vm1982_vm5, %v2581_v47 }
 0x288   : > { %v2570_v56 = vpop.f32.mrf.mxu1 }
 0x290   : > { %v2572_v57 = vpop.f32.mrf.mxu1 }
 0x291   : > { %v2602_v62 = vpack.c.bf16 %v2572_v57, %v2570_v56 }
 0x298   : > { %v2575_v59 = vpop.f32.mrf.mxu1 }
 0x2a0   : > { %v2577_v60 = vpop.f32.mrf.mxu1 }
 0x2a1   : > { %v2603_v61 = vpack.c.bf16 %v2577_v60, %v2575_v59 }
 0x2a3   : > { %2614 = vmatpush.bf16.msra.mxu2 %v2603_v61 }
 0x2a7   : > { %2615 = vmatpush.bf16.msra.mxu2 %v2602_v62 }
 0x2e7   : > { %v2596_v41 = vpop.f32.mrf.mxu0 }
 0x2e8   : > { %v2597_v1 = vadd.f32 %v2596_v41, %v2583_v63 }
 0x2ea   : > { %v2600_v2 = vmax.f32 %v2597_v1, 0.0 }
 0x2ec   : > { %v2601_v3 = vpack.c.bf16 %v2600_v2, %v2600_v2 }
 0x2ee   : > { %3616 = vmatmul.msk.bf16.vlgmr.msra.gmra.mxu2 %vm465_vm0, %v2601_v3 }
 0x2ef   : > { %v2598_v19 = vpop.f32.mrf.mxu0 }
 0x371   : > { %v2617_v11 = vpop.f32.mrf.mxu2 }
 0x372   : > { %v2618_v6 = vadd.f32 %v2617_v11, %v2604_v5 }
 0x374   : > { %3894 = vtanh.f32 %v2618_v6 }
 0x379   : > { %v2619_v7 = vpop.f32.mrf.mxu2 }
 0x37a   : > { %v3895_v8 = vpop.eup %3894 }
 0x37b   : > { %2622 = vst [vmem:[%s428_s25] sm:$0xff] %v3895_v8 }
 0x37c PF: > { %s23_s17 = sadd.s32 1, %s4000_s17  }
 0x37d   : > { %p20_p7 = scmp.ge.s32.totalorder %s23_s17, 18  }
 0x37f   :  { %22 = sbr.rel (!%p20_p7) target bundleno = 4 (0x4), region = 107 }
 0x384   :  { %2642 = vsyncpa [#allocation3], 1 }
 0x385   :  { %2644 = vsyncpa [#allocation3 + $0x1], 1 }
 0x386   :  { %2645 = vsyncpa [#allocation5], 1 }

</bundles_post_ra>
